<compile_context>
chip_gen: v6e
topology: v6e:2x2x1
jax: 0.10.0
libtpu: 0.0.40
codegen_flags: <defaults>
</compile_context>

<pallas_src>
import jax
import jax.numpy as jnp
import numpy as np
from jax.experimental import pallas as pl
from jax.experimental.pallas import tpu as pltpu


# ----------------------------------------------------------------------------
# Fused LeNet-5 kernel (one image per grid step; everything VMEM resident)
# ----------------------------------------------------------------------------
def lenet5_kernel(x_ref,                      # (1, 32, 32) padded input image
                  s1_ref, cb1_ref, b1_ref,    # conv1: row shifts, banded W, bias row
                  cs1_ref, rs1_ref,           # pool1: column / row selection mats
                  s2_ref, cb2_ref, b2_ref,    # conv2
                  cs2_ref, rs2_ref,           # pool2
                  wf1_ref, bf1_ref,           # fc1 (flatten permutation folded in)
                  wf2_ref, bf2_ref,           # fc2
                  wf3_ref, bf3_ref,           # fc3
                  o_ref):                     # (1, 1, 10)
    def dot(a, b):
        return jnp.dot(a, b, preferred_element_type=jnp.float32)

    x = x_ref[0]                                               # (32, 32)

    # ---- conv1 (5x5, pad=2 pre-applied) + bias + ReLU ----------------------
    # Result layout: (H=32, Cout*W = 6*28).  Rows >= 28 are junk and are never
    # selected by the pooling matrices below.
    acc1 = dot(x, cb1_ref[0])
    for ki in range(1, 5):
        acc1 = acc1 + dot(dot(s1_ref[ki], x), cb1_ref[ki])
    c1 = jnp.maximum(acc1 + b1_ref[...], 0.0)                  # (32, 168)

    # ---- maxpool1 2x2 (exact 0/1 selection matmuls + elementwise max) ------
    t1 = jnp.maximum(dot(c1, cs1_ref[0]), dot(c1, cs1_ref[1]))  # (32, 84)
    h1 = jnp.maximum(dot(rs1_ref[0], t1), dot(rs1_ref[1], t1))  # (14, 84)

    # ---- conv2 (5x5 valid, 6 -> 16 channels) + bias + ReLU -----------------
    acc2 = dot(h1, cb2_ref[0])
    for ki in range(1, 5):
        acc2 = acc2 + dot(dot(s2_ref[ki], h1), cb2_ref[ki])
    c2 = jnp.maximum(acc2 + b2_ref[...], 0.0)                  # (14, 160); rows>=10 junk

    # ---- maxpool2 2x2 ------------------------------------------------------
    t2 = jnp.maximum(dot(c2, cs2_ref[0]), dot(c2, cs2_ref[1]))  # (14, 80)
    h2 = jnp.maximum(dot(rs2_ref[0], t2), dot(rs2_ref[1], t2))  # (5, 80)

    # ---- fc1 + ReLU (PyTorch (C,H,W) flatten order folded into wf1) --------
    y = bf1_ref[...]
    for r in range(5):
        y = y + dot(h2[r:r + 1, :], wf1_ref[r])                # (1, 120)
    y = jnp.maximum(y, 0.0)

    # ---- fc2 + ReLU, fc3 ----------------------------------------------------
    y = jnp.maximum(dot(y, wf2_ref[...]) + bf2_ref[...], 0.0)  # (1, 84)
    y = dot(y, wf3_ref[...]) + bf3_ref[...]                    # (1, 10)

    o_ref[0] = y.astype(o_ref.dtype)


# ----------------------------------------------------------------------------
# Constant helper matrices (built once, passed as kernel inputs)
# ----------------------------------------------------------------------------
def _shift_mats(n, k):
    # (k, n, n):  (S[s] @ X)[h, :] = X[h + s, :]  (zero-filled past the end)
    return np.stack([np.eye(n, n, s, dtype=np.float32) for s in range(k)])


def _pool_row_sel(rows_out, rows_in):
    # (2, rows_out, rows_in):  m[a, r, 2r + a] = 1
    m = np.zeros((2, rows_out, rows_in), np.float32)
    r = np.arange(rows_out)
    m[0, r, 2 * r] = 1.0
    m[1, r, 2 * r + 1] = 1.0
    return m


def _pool_col_sel(channels, w_in, w_out):
    # (2, channels*w_in, channels*w_out):  m[a, c*w_in + 2q + a, c*w_out + q] = 1
    m = np.zeros((2, channels * w_in, channels * w_out), np.float32)
    q = np.arange(w_out)
    for c in range(channels):
        m[0, c * w_in + 2 * q, c * w_out + q] = 1.0
        m[1, c * w_in + 2 * q + 1, c * w_out + q] = 1.0
    return m


def _band_mask(j_dim, w_dim, k):
    # (j_dim, w_dim, k):  mask[j, w, kj] = (j == w + kj)
    j = np.arange(j_dim)[:, None, None]
    w = np.arange(w_dim)[None, :, None]
    kj = np.arange(k)[None, None, :]
    return (j == w + kj).astype(np.float32)


def prepare_lenet5_params(params):
    """Fold PyTorch-layout weights into the kernel's matmul-friendly layouts."""
    w1, b1, w2, b2, wf1, bf1, wf2, bf2, wf3, bf3 = params
    f32 = jnp.float32

    # conv1 banded weights: CB1[ki, j, co*28 + w] = w1[co, 0, ki, j - w] (band 0..4)
    m1 = _band_mask(32, 28, 5)                              # [j, w, kj]
    w1t = jnp.transpose(w1[:, 0, :, :], (1, 0, 2))          # [ki, co, kj]
    cb1 = (m1[None, :, None, :, :] * w1t[:, None, :, None, :]).sum(-1)
    cb1 = cb1.reshape(5, 32, 6 * 28).astype(f32)            # (5, 32, 168)
    b1r = jnp.repeat(b1, 28).reshape(1, 6 * 28).astype(f32)

    # conv2 banded weights: CB2[ki, ci*14 + j, co*10 + ow] = w2[co, ci, ki, j - ow]
    m2 = _band_mask(14, 10, 5)                              # [j, ow, kj]
    w2t = jnp.transpose(w2, (2, 1, 0, 3))                   # [ki, ci, co, kj]
    cb2 = (m2[None, None, :, None, :, :] * w2t[:, :, None, :, None, :]).sum(-1)
    cb2 = cb2.reshape(5, 6 * 14, 16 * 10).astype(f32)       # (5, 84, 160)
    b2r = jnp.repeat(b2, 10).reshape(1, 16 * 10).astype(f32)

    # fc weights.  fc1 gets the (ho, co, wo) -> PyTorch (co, ho, wo) permutation.
    wf1m = jnp.transpose(wf1.reshape(120, 16, 5, 5), (2, 1, 3, 0))
    wf1m = wf1m.reshape(5, 16 * 5, 120).astype(f32)         # (5, 80, 120)
    bf1r = bf1.reshape(1, 120).astype(f32)
    wf2m = wf2.T.astype(f32)                                # (120, 84)
    bf2r = bf2.reshape(1, 84).astype(f32)
    wf3m = wf3.T.astype(f32)                                # (84, 10)
    bf3r = bf3.reshape(1, 10).astype(f32)

    # structural 0/1 constants
    s1 = jnp.asarray(_shift_mats(32, 5))                    # (5, 32, 32)
    s2 = jnp.asarray(_shift_mats(14, 5))                    # (5, 14, 14)
    cs1 = jnp.asarray(_pool_col_sel(6, 28, 14))             # (2, 168, 84)
    rs1 = jnp.asarray(_pool_row_sel(14, 32))                # (2, 14, 32)
    cs2 = jnp.asarray(_pool_col_sel(16, 10, 5))             # (2, 160, 80)
    rs2 = jnp.asarray(_pool_row_sel(5, 14))                 # (2, 5, 14)

    return (s1, cb1, b1r, cs1, rs1, s2, cb2, b2r, cs2, rs2,
            wf1m, bf1r, wf2m, bf2r, wf3m, bf3r)


# ----------------------------------------------------------------------------
# Forward wrapper: one fused pallas_call over the batch
# ----------------------------------------------------------------------------
def lenet5_forward(x_nchw, prepped):
    (s1, cb1, b1r, cs1, rs1, s2, cb2, b2r, cs2, rs2,
     wf1m, bf1r, wf2m, bf2r, wf3m, bf3r) = prepped

    n = x_nchw.shape[0]
    # single input channel; fold conv1's pad=2 into the input (28x28 -> 32x32)
    x = jnp.pad(x_nchw[:, 0, :, :], ((0, 0), (2, 2), (2, 2))).astype(jnp.float32)

    def full(shape):
        return pl.BlockSpec(shape, lambda i, _s=shape: (0,) * len(_s))

    out = pl.pallas_call(
        lenet5_kernel,
        out_shape=jax.ShapeDtypeStruct((n, 1, 10), jnp.float32),
        grid=(n,),
        in_specs=[
            pl.BlockSpec((1, 32, 32), lambda i: (i, 0, 0)),   # x (per image)
            full((5, 32, 32)),      # S1
            full((5, 32, 168)),     # CB1
            full((1, 168)),         # b1 row
            full((2, 168, 84)),     # CS1
            full((2, 14, 32)),      # RS1
            full((5, 14, 14)),      # S2
            full((5, 84, 160)),     # CB2
            full((1, 160)),         # b2 row
            full((2, 160, 80)),     # CS2
            full((2, 5, 14)),       # RS2
            full((5, 80, 120)),     # Wf1
            full((1, 120)),         # bf1
            full((120, 84)),        # Wf2
            full((1, 84)),          # bf2
            full((84, 10)),         # Wf3
            full((1, 10)),          # bf3
        ],
        out_specs=pl.BlockSpec((1, 1, 10), lambda i: (i, 0, 0)),
        compiler_params=pltpu.CompilerParams(
            dimension_semantics=("parallel",)),
    )(x, s1, cb1, b1r, cs1, rs1, s2, cb2, b2r, cs2, rs2,
      wf1m, bf1r, wf2m, bf2r, wf3m, bf3r)

    return out.reshape(n, 10)


# ----------------------------------------------------------------------------
# Parameter init (PyTorch default-like) and pure-JAX reference
# ----------------------------------------------------------------------------
def init_params(key):
    ks = jax.random.split(key, 10)

    def u(k, shape, fan_in):
        bound = 1.0 / jnp.sqrt(jnp.float32(fan_in))
        return jax.random.uniform(k, shape, jnp.float32, -bound, bound)

    w1 = u(ks[0], (6, 1, 5, 5), 25);    b1 = u(ks[1], (6,), 25)
    w2 = u(ks[2], (16, 6, 5, 5), 150);  b2 = u(ks[3], (16,), 150)
    wf1 = u(ks[4], (120, 400), 400);    bf1 = u(ks[5], (120,), 400)
    wf2 = u(ks[6], (84, 120), 120);     bf2 = u(ks[7], (84,), 120)
    wf3 = u(ks[8], (10, 84), 84);       bf3 = u(ks[9], (10,), 84)
    return (w1, b1, w2, b2, wf1, bf1, wf2, bf2, wf3, bf3)


def lenet5_ref(x, params):
    # pure-JAX reference mirroring the PyTorch forward exactly (NCHW).
    (w1, b1, w2, b2, wf1, bf1, wf2, bf2, wf3, bf3) = params
    n = x.shape[0]
    dn = ("NCHW", "OIHW", "NCHW")
    c1 = jax.lax.conv_general_dilated(x, w1, (1, 1), ((2, 2), (2, 2)),
                                      dimension_numbers=dn)
    c1 = jnp.maximum(c1 + b1[None, :, None, None], 0.0)
    p1 = c1.reshape(n, 6, 14, 2, 14, 2).max(axis=(3, 5))
    c2 = jax.lax.conv_general_dilated(p1, w2, (1, 1), "VALID",
                                      dimension_numbers=dn)
    c2 = jnp.maximum(c2 + b2[None, :, None, None], 0.0)
    p2 = c2.reshape(n, 16, 5, 2, 5, 2).max(axis=(3, 5))
    f = p2.reshape(n, 400)
    h1 = jnp.maximum(f @ wf1.T + bf1, 0.0)
    h2 = jnp.maximum(h1 @ wf2.T + bf2, 0.0)
    return h2 @ wf3.T + bf3


if __name__ == "__main__":
    key = jax.random.PRNGKey(0)
    kx, kp = jax.random.split(key)
    # 28x28 single-channel input is required by the module (fc1 expects 16*5*5).
    x = jax.random.normal(kx, (2, 1, 28, 28), jnp.float32)
    params = init_params(kp)
    prepped = prepare_lenet5_params(params)

    fwd = jax.jit(lenet5_forward)
    out = jax.block_until_ready(fwd(x, prepped))
    ref = lenet5_ref(x, params)

    assert out.shape == (2, 10), out.shape
    max_err = float(jnp.max(jnp.abs(out - ref)))
    assert max_err < 1e-3, max_err
    print("KERNEL_OK")
</pallas_src>

<mosaic_0001>
module attributes {stable_mosaic.version = 11 : i64} {
  func.func @lenet5_kernel(%arg0: i32, %arg1: memref<1x32x32xf32, #tpu.memory_space<vmem>>, %arg2: memref<5x32x32xf32, #tpu.memory_space<vmem>>, %arg3: memref<5x32x168xf32, #tpu.memory_space<vmem>>, %arg4: memref<1x168xf32, #tpu.memory_space<vmem>>, %arg5: memref<2x168x84xf32, #tpu.memory_space<vmem>>, %arg6: memref<2x14x32xf32, #tpu.memory_space<vmem>>, %arg7: memref<5x14x14xf32, #tpu.memory_space<vmem>>, %arg8: memref<5x84x160xf32, #tpu.memory_space<vmem>>, %arg9: memref<1x160xf32, #tpu.memory_space<vmem>>, %arg10: memref<2x160x80xf32, #tpu.memory_space<vmem>>, %arg11: memref<2x5x14xf32, #tpu.memory_space<vmem>>, %arg12: memref<5x80x120xf32, #tpu.memory_space<vmem>>, %arg13: memref<1x120xf32, #tpu.memory_space<vmem>>, %arg14: memref<120x84xf32, #tpu.memory_space<vmem>>, %arg15: memref<1x84xf32, #tpu.memory_space<vmem>>, %arg16: memref<84x10xf32, #tpu.memory_space<vmem>>, %arg17: memref<1x10xf32, #tpu.memory_space<vmem>>, %arg18: memref<1x1x10xf32, #tpu.memory_space<vmem>>) attributes {dimension_semantics = [#tpu.dimension_semantics<parallel>], iteration_bounds = array<i64: 2>, scalar_prefetch = 0 : i64, scratch_operands = 0 : i64, tpu.core_type = #tpu.core_type<tc>, window_params = [{transform_indices = @transform_0, window_bounds = array<i64: 1, 32, 32>}, {pipeline_mode = #tpu.pipeline_mode<synchronous>, transform_indices = @transform_1, window_bounds = array<i64: 5, 32, 32>}, {pipeline_mode = #tpu.pipeline_mode<synchronous>, transform_indices = @transform_2, window_bounds = array<i64: 5, 32, 168>}, {pipeline_mode = #tpu.pipeline_mode<synchronous>, transform_indices = @transform_3, window_bounds = array<i64: 1, 168>}, {pipeline_mode = #tpu.pipeline_mode<synchronous>, transform_indices = @transform_4, window_bounds = array<i64: 2, 168, 84>}, {pipeline_mode = #tpu.pipeline_mode<synchronous>, transform_indices = @transform_5, window_bounds = array<i64: 2, 14, 32>}, {pipeline_mode = #tpu.pipeline_mode<synchronous>, transform_indices = @transform_6, window_bounds = array<i64: 5, 14, 14>}, {pipeline_mode = #tpu.pipeline_mode<synchronous>, transform_indices = @transform_7, window_bounds = array<i64: 5, 84, 160>}, {pipeline_mode = #tpu.pipeline_mode<synchronous>, transform_indices = @transform_8, window_bounds = array<i64: 1, 160>}, {pipeline_mode = #tpu.pipeline_mode<synchronous>, transform_indices = @transform_9, window_bounds = array<i64: 2, 160, 80>}, {pipeline_mode = #tpu.pipeline_mode<synchronous>, transform_indices = @transform_10, window_bounds = array<i64: 2, 5, 14>}, {pipeline_mode = #tpu.pipeline_mode<synchronous>, transform_indices = @transform_11, window_bounds = array<i64: 5, 80, 120>}, {pipeline_mode = #tpu.pipeline_mode<synchronous>, transform_indices = @transform_12, window_bounds = array<i64: 1, 120>}, {pipeline_mode = #tpu.pipeline_mode<synchronous>, transform_indices = @transform_13, window_bounds = array<i64: 120, 84>}, {pipeline_mode = #tpu.pipeline_mode<synchronous>, transform_indices = @transform_14, window_bounds = array<i64: 1, 84>}, {pipeline_mode = #tpu.pipeline_mode<synchronous>, transform_indices = @transform_15, window_bounds = array<i64: 84, 10>}, {pipeline_mode = #tpu.pipeline_mode<synchronous>, transform_indices = @transform_16, window_bounds = array<i64: 1, 10>}, {transform_indices = @transform_17, window_bounds = array<i64: 1, 1, 10>}]} {
    %c0 = arith.constant 0 : index
    %c0_0 = arith.constant 0 : index
    %c0_1 = arith.constant 0 : index
    %0 = vector.load %arg1[%c0, %c0_0, %c0_1] : memref<1x32x32xf32, #tpu.memory_space<vmem>>, vector<1x32x32xf32>
    %1 = vector.shape_cast %0 : vector<1x32x32xf32> to vector<32x32xf32>
    %c0_2 = arith.constant 0 : index
    %c0_3 = arith.constant 0 : index
    %c0_4 = arith.constant 0 : index
    %2 = vector.load %arg3[%c0_2, %c0_3, %c0_4] : memref<5x32x168xf32, #tpu.memory_space<vmem>>, vector<1x32x168xf32>
    %3 = vector.shape_cast %2 : vector<1x32x168xf32> to vector<32x168xf32>
    %cst = arith.constant dense<0.000000e+00> : vector<32x168xf32>
    %4 = tpu.matmul %1, %3, %cst {dimension_numbers = #tpu.dot_dimension_numbers<[1], [0], [0], [1], [0, 0, 1, 1], [], []>} : vector<32x32xf32>, vector<32x168xf32>, vector<32x168xf32> -> vector<32x168xf32>
    %c1 = arith.constant 1 : index
    %c0_5 = arith.constant 0 : index
    %c0_6 = arith.constant 0 : index
    %5 = vector.load %arg2[%c1, %c0_5, %c0_6] : memref<5x32x32xf32, #tpu.memory_space<vmem>>, vector<1x32x32xf32>
    %6 = vector.shape_cast %5 : vector<1x32x32xf32> to vector<32x32xf32>
    %cst_7 = arith.constant dense<0.000000e+00> : vector<32x32xf32>
    %7 = tpu.matmul %6, %1, %cst_7 {dimension_numbers = #tpu.dot_dimension_numbers<[1], [0], [0], [1], [0, 0, 1, 1], [], []>} : vector<32x32xf32>, vector<32x32xf32>, vector<32x32xf32> -> vector<32x32xf32>
    %c1_8 = arith.constant 1 : index
    %c0_9 = arith.constant 0 : index
    %c0_10 = arith.constant 0 : index
    %8 = vector.load %arg3[%c1_8, %c0_9, %c0_10] : memref<5x32x168xf32, #tpu.memory_space<vmem>>, vector<1x32x168xf32>
    %9 = vector.shape_cast %8 : vector<1x32x168xf32> to vector<32x168xf32>
    %cst_11 = arith.constant dense<0.000000e+00> : vector<32x168xf32>
    %10 = tpu.matmul %7, %9, %cst_11 {dimension_numbers = #tpu.dot_dimension_numbers<[1], [0], [0], [1], [0, 0, 1, 1], [], []>} : vector<32x32xf32>, vector<32x168xf32>, vector<32x168xf32> -> vector<32x168xf32>
    %11 = arith.addf %4, %10 : vector<32x168xf32>
    %c2 = arith.constant 2 : index
    %c0_12 = arith.constant 0 : index
    %c0_13 = arith.constant 0 : index
    %12 = vector.load %arg2[%c2, %c0_12, %c0_13] : memref<5x32x32xf32, #tpu.memory_space<vmem>>, vector<1x32x32xf32>
    %13 = vector.shape_cast %12 : vector<1x32x32xf32> to vector<32x32xf32>
    %cst_14 = arith.constant dense<0.000000e+00> : vector<32x32xf32>
    %14 = tpu.matmul %13, %1, %cst_14 {dimension_numbers = #tpu.dot_dimension_numbers<[1], [0], [0], [1], [0, 0, 1, 1], [], []>} : vector<32x32xf32>, vector<32x32xf32>, vector<32x32xf32> -> vector<32x32xf32>
    %c2_15 = arith.constant 2 : index
    %c0_16 = arith.constant 0 : index
    %c0_17 = arith.constant 0 : index
    %15 = vector.load %arg3[%c2_15, %c0_16, %c0_17] : memref<5x32x168xf32, #tpu.memory_space<vmem>>, vector<1x32x168xf32>
    %16 = vector.shape_cast %15 : vector<1x32x168xf32> to vector<32x168xf32>
    %cst_18 = arith.constant dense<0.000000e+00> : vector<32x168xf32>
    %17 = tpu.matmul %14, %16, %cst_18 {dimension_numbers = #tpu.dot_dimension_numbers<[1], [0], [0], [1], [0, 0, 1, 1], [], []>} : vector<32x32xf32>, vector<32x168xf32>, vector<32x168xf32> -> vector<32x168xf32>
    %18 = arith.addf %11, %17 : vector<32x168xf32>
    %c3 = arith.constant 3 : index
    %c0_19 = arith.constant 0 : index
    %c0_20 = arith.constant 0 : index
    %19 = vector.load %arg2[%c3, %c0_19, %c0_20] : memref<5x32x32xf32, #tpu.memory_space<vmem>>, vector<1x32x32xf32>
    %20 = vector.shape_cast %19 : vector<1x32x32xf32> to vector<32x32xf32>
    %cst_21 = arith.constant dense<0.000000e+00> : vector<32x32xf32>
    %21 = tpu.matmul %20, %1, %cst_21 {dimension_numbers = #tpu.dot_dimension_numbers<[1], [0], [0], [1], [0, 0, 1, 1], [], []>} : vector<32x32xf32>, vector<32x32xf32>, vector<32x32xf32> -> vector<32x32xf32>
    %c3_22 = arith.constant 3 : index
    %c0_23 = arith.constant 0 : index
    %c0_24 = arith.constant 0 : index
    %22 = vector.load %arg3[%c3_22, %c0_23, %c0_24] : memref<5x32x168xf32, #tpu.memory_space<vmem>>, vector<1x32x168xf32>
    %23 = vector.shape_cast %22 : vector<1x32x168xf32> to vector<32x168xf32>
    %cst_25 = arith.constant dense<0.000000e+00> : vector<32x168xf32>
    %24 = tpu.matmul %21, %23, %cst_25 {dimension_numbers = #tpu.dot_dimension_numbers<[1], [0], [0], [1], [0, 0, 1, 1], [], []>} : vector<32x32xf32>, vector<32x168xf32>, vector<32x168xf32> -> vector<32x168xf32>
    %25 = arith.addf %18, %24 : vector<32x168xf32>
    %c4 = arith.constant 4 : index
    %c0_26 = arith.constant 0 : index
    %c0_27 = arith.constant 0 : index
    %26 = vector.load %arg2[%c4, %c0_26, %c0_27] : memref<5x32x32xf32, #tpu.memory_space<vmem>>, vector<1x32x32xf32>
    %27 = vector.shape_cast %26 : vector<1x32x32xf32> to vector<32x32xf32>
    %cst_28 = arith.constant dense<0.000000e+00> : vector<32x32xf32>
    %28 = tpu.matmul %27, %1, %cst_28 {dimension_numbers = #tpu.dot_dimension_numbers<[1], [0], [0], [1], [0, 0, 1, 1], [], []>} : vector<32x32xf32>, vector<32x32xf32>, vector<32x32xf32> -> vector<32x32xf32>
    %c4_29 = arith.constant 4 : index
    %c0_30 = arith.constant 0 : index
    %c0_31 = arith.constant 0 : index
    %29 = vector.load %arg3[%c4_29, %c0_30, %c0_31] : memref<5x32x168xf32, #tpu.memory_space<vmem>>, vector<1x32x168xf32>
    %30 = vector.shape_cast %29 : vector<1x32x168xf32> to vector<32x168xf32>
    %cst_32 = arith.constant dense<0.000000e+00> : vector<32x168xf32>
    %31 = tpu.matmul %28, %30, %cst_32 {dimension_numbers = #tpu.dot_dimension_numbers<[1], [0], [0], [1], [0, 0, 1, 1], [], []>} : vector<32x32xf32>, vector<32x168xf32>, vector<32x168xf32> -> vector<32x168xf32>
    %32 = arith.addf %25, %31 : vector<32x168xf32>
    %c0_33 = arith.constant 0 : index
    %c0_34 = arith.constant 0 : index
    %33 = vector.load %arg4[%c0_33, %c0_34] : memref<1x168xf32, #tpu.memory_space<vmem>>, vector<1x168xf32>
    %34 = vector.broadcast %33 : vector<1x168xf32> to vector<32x168xf32>
    %35 = arith.addf %32, %34 : vector<32x168xf32>
    %cst_35 = arith.constant 0.000000e+00 : f32
    %36 = vector.broadcast %cst_35 : f32 to vector<32x168xf32>
    %37 = arith.maximumf %35, %36 : vector<32x168xf32>
    %c0_36 = arith.constant 0 : index
    %c0_37 = arith.constant 0 : index
    %c0_38 = arith.constant 0 : index
    %38 = vector.load %arg5[%c0_36, %c0_37, %c0_38] : memref<2x168x84xf32, #tpu.memory_space<vmem>>, vector<1x168x84xf32>
    %39 = vector.shape_cast %38 : vector<1x168x84xf32> to vector<168x84xf32>
    %cst_39 = arith.constant dense<0.000000e+00> : vector<32x84xf32>
    %40 = tpu.matmul %37, %39, %cst_39 {dimension_numbers = #tpu.dot_dimension_numbers<[1], [0], [0], [1], [0, 0, 1, 1], [], []>} : vector<32x168xf32>, vector<168x84xf32>, vector<32x84xf32> -> vector<32x84xf32>
    %c1_40 = arith.constant 1 : index
    %c0_41 = arith.constant 0 : index
    %c0_42 = arith.constant 0 : index
    %41 = vector.load %arg5[%c1_40, %c0_41, %c0_42] : memref<2x168x84xf32, #tpu.memory_space<vmem>>, vector<1x168x84xf32>
    %42 = vector.shape_cast %41 : vector<1x168x84xf32> to vector<168x84xf32>
    %cst_43 = arith.constant dense<0.000000e+00> : vector<32x84xf32>
    %43 = tpu.matmul %37, %42, %cst_43 {dimension_numbers = #tpu.dot_dimension_numbers<[1], [0], [0], [1], [0, 0, 1, 1], [], []>} : vector<32x168xf32>, vector<168x84xf32>, vector<32x84xf32> -> vector<32x84xf32>
    %44 = arith.maximumf %40, %43 : vector<32x84xf32>
    %c0_44 = arith.constant 0 : index
    %c0_45 = arith.constant 0 : index
    %c0_46 = arith.constant 0 : index
    %45 = vector.load %arg6[%c0_44, %c0_45, %c0_46] : memref<2x14x32xf32, #tpu.memory_space<vmem>>, vector<1x14x32xf32>
    %46 = vector.shape_cast %45 : vector<1x14x32xf32> to vector<14x32xf32>
    %cst_47 = arith.constant dense<0.000000e+00> : vector<14x84xf32>
    %47 = tpu.matmul %46, %44, %cst_47 {dimension_numbers = #tpu.dot_dimension_numbers<[1], [0], [0], [1], [0, 0, 1, 1], [], []>} : vector<14x32xf32>, vector<32x84xf32>, vector<14x84xf32> -> vector<14x84xf32>
    %c1_48 = arith.constant 1 : index
    %c0_49 = arith.constant 0 : index
    %c0_50 = arith.constant 0 : index
    %48 = vector.load %arg6[%c1_48, %c0_49, %c0_50] : memref<2x14x32xf32, #tpu.memory_space<vmem>>, vector<1x14x32xf32>
    %49 = vector.shape_cast %48 : vector<1x14x32xf32> to vector<14x32xf32>
    %cst_51 = arith.constant dense<0.000000e+00> : vector<14x84xf32>
    %50 = tpu.matmul %49, %44, %cst_51 {dimension_numbers = #tpu.dot_dimension_numbers<[1], [0], [0], [1], [0, 0, 1, 1], [], []>} : vector<14x32xf32>, vector<32x84xf32>, vector<14x84xf32> -> vector<14x84xf32>
    %51 = arith.maximumf %47, %50 : vector<14x84xf32>
    %c0_52 = arith.constant 0 : index
    %c0_53 = arith.constant 0 : index
    %c0_54 = arith.constant 0 : index
    %52 = vector.load %arg8[%c0_52, %c0_53, %c0_54] : memref<5x84x160xf32, #tpu.memory_space<vmem>>, vector<1x84x160xf32>
    %53 = vector.shape_cast %52 : vector<1x84x160xf32> to vector<84x160xf32>
    %cst_55 = arith.constant dense<0.000000e+00> : vector<14x160xf32>
    %54 = tpu.matmul %51, %53, %cst_55 {dimension_numbers = #tpu.dot_dimension_numbers<[1], [0], [0], [1], [0, 0, 1, 1], [], []>} : vector<14x84xf32>, vector<84x160xf32>, vector<14x160xf32> -> vector<14x160xf32>
    %c1_56 = arith.constant 1 : index
    %c0_57 = arith.constant 0 : index
    %c0_58 = arith.constant 0 : index
    %55 = vector.load %arg7[%c1_56, %c0_57, %c0_58] : memref<5x14x14xf32, #tpu.memory_space<vmem>>, vector<1x14x14xf32>
    %56 = vector.shape_cast %55 : vector<1x14x14xf32> to vector<14x14xf32>
    %cst_59 = arith.constant dense<0.000000e+00> : vector<14x84xf32>
    %57 = tpu.matmul %56, %51, %cst_59 {dimension_numbers = #tpu.dot_dimension_numbers<[1], [0], [0], [1], [0, 0, 1, 1], [], []>} : vector<14x14xf32>, vector<14x84xf32>, vector<14x84xf32> -> vector<14x84xf32>
    %c1_60 = arith.constant 1 : index
    %c0_61 = arith.constant 0 : index
    %c0_62 = arith.constant 0 : index
    %58 = vector.load %arg8[%c1_60, %c0_61, %c0_62] : memref<5x84x160xf32, #tpu.memory_space<vmem>>, vector<1x84x160xf32>
    %59 = vector.shape_cast %58 : vector<1x84x160xf32> to vector<84x160xf32>
    %cst_63 = arith.constant dense<0.000000e+00> : vector<14x160xf32>
    %60 = tpu.matmul %57, %59, %cst_63 {dimension_numbers = #tpu.dot_dimension_numbers<[1], [0], [0], [1], [0, 0, 1, 1], [], []>} : vector<14x84xf32>, vector<84x160xf32>, vector<14x160xf32> -> vector<14x160xf32>
    %61 = arith.addf %54, %60 : vector<14x160xf32>
    %c2_64 = arith.constant 2 : index
    %c0_65 = arith.constant 0 : index
    %c0_66 = arith.constant 0 : index
    %62 = vector.load %arg7[%c2_64, %c0_65, %c0_66] : memref<5x14x14xf32, #tpu.memory_space<vmem>>, vector<1x14x14xf32>
    %63 = vector.shape_cast %62 : vector<1x14x14xf32> to vector<14x14xf32>
    %cst_67 = arith.constant dense<0.000000e+00> : vector<14x84xf32>
    %64 = tpu.matmul %63, %51, %cst_67 {dimension_numbers = #tpu.dot_dimension_numbers<[1], [0], [0], [1], [0, 0, 1, 1], [], []>} : vector<14x14xf32>, vector<14x84xf32>, vector<14x84xf32> -> vector<14x84xf32>
    %c2_68 = arith.constant 2 : index
    %c0_69 = arith.constant 0 : index
    %c0_70 = arith.constant 0 : index
    %65 = vector.load %arg8[%c2_68, %c0_69, %c0_70] : memref<5x84x160xf32, #tpu.memory_space<vmem>>, vector<1x84x160xf32>
    %66 = vector.shape_cast %65 : vector<1x84x160xf32> to vector<84x160xf32>
    %cst_71 = arith.constant dense<0.000000e+00> : vector<14x160xf32>
    %67 = tpu.matmul %64, %66, %cst_71 {dimension_numbers = #tpu.dot_dimension_numbers<[1], [0], [0], [1], [0, 0, 1, 1], [], []>} : vector<14x84xf32>, vector<84x160xf32>, vector<14x160xf32> -> vector<14x160xf32>
    %68 = arith.addf %61, %67 : vector<14x160xf32>
    %c3_72 = arith.constant 3 : index
    %c0_73 = arith.constant 0 : index
    %c0_74 = arith.constant 0 : index
    %69 = vector.load %arg7[%c3_72, %c0_73, %c0_74] : memref<5x14x14xf32, #tpu.memory_space<vmem>>, vector<1x14x14xf32>
    %70 = vector.shape_cast %69 : vector<1x14x14xf32> to vector<14x14xf32>
    %cst_75 = arith.constant dense<0.000000e+00> : vector<14x84xf32>
    %71 = tpu.matmul %70, %51, %cst_75 {dimension_numbers = #tpu.dot_dimension_numbers<[1], [0], [0], [1], [0, 0, 1, 1], [], []>} : vector<14x14xf32>, vector<14x84xf32>, vector<14x84xf32> -> vector<14x84xf32>
    %c3_76 = arith.constant 3 : index
    %c0_77 = arith.constant 0 : index
    %c0_78 = arith.constant 0 : index
    %72 = vector.load %arg8[%c3_76, %c0_77, %c0_78] : memref<5x84x160xf32, #tpu.memory_space<vmem>>, vector<1x84x160xf32>
    %73 = vector.shape_cast %72 : vector<1x84x160xf32> to vector<84x160xf32>
    %cst_79 = arith.constant dense<0.000000e+00> : vector<14x160xf32>
    %74 = tpu.matmul %71, %73, %cst_79 {dimension_numbers = #tpu.dot_dimension_numbers<[1], [0], [0], [1], [0, 0, 1, 1], [], []>} : vector<14x84xf32>, vector<84x160xf32>, vector<14x160xf32> -> vector<14x160xf32>
    %75 = arith.addf %68, %74 : vector<14x160xf32>
    %c4_80 = arith.constant 4 : index
    %c0_81 = arith.constant 0 : index
    %c0_82 = arith.constant 0 : index
    %76 = vector.load %arg7[%c4_80, %c0_81, %c0_82] : memref<5x14x14xf32, #tpu.memory_space<vmem>>, vector<1x14x14xf32>
    %77 = vector.shape_cast %76 : vector<1x14x14xf32> to vector<14x14xf32>
    %cst_83 = arith.constant dense<0.000000e+00> : vector<14x84xf32>
    %78 = tpu.matmul %77, %51, %cst_83 {dimension_numbers = #tpu.dot_dimension_numbers<[1], [0], [0], [1], [0, 0, 1, 1], [], []>} : vector<14x14xf32>, vector<14x84xf32>, vector<14x84xf32> -> vector<14x84xf32>
    %c4_84 = arith.constant 4 : index
    %c0_85 = arith.constant 0 : index
    %c0_86 = arith.constant 0 : index
    %79 = vector.load %arg8[%c4_84, %c0_85, %c0_86] : memref<5x84x160xf32, #tpu.memory_space<vmem>>, vector<1x84x160xf32>
    %80 = vector.shape_cast %79 : vector<1x84x160xf32> to vector<84x160xf32>
    %cst_87 = arith.constant dense<0.000000e+00> : vector<14x160xf32>
    %81 = tpu.matmul %78, %80, %cst_87 {dimension_numbers = #tpu.dot_dimension_numbers<[1], [0], [0], [1], [0, 0, 1, 1], [], []>} : vector<14x84xf32>, vector<84x160xf32>, vector<14x160xf32> -> vector<14x160xf32>
    %82 = arith.addf %75, %81 : vector<14x160xf32>
    %c0_88 = arith.constant 0 : index
    %c0_89 = arith.constant 0 : index
    %83 = vector.load %arg9[%c0_88, %c0_89] : memref<1x160xf32, #tpu.memory_space<vmem>>, vector<1x160xf32>
    %84 = vector.broadcast %83 : vector<1x160xf32> to vector<14x160xf32>
    %85 = arith.addf %82, %84 : vector<14x160xf32>
    %cst_90 = arith.constant 0.000000e+00 : f32
    %86 = vector.broadcast %cst_90 : f32 to vector<14x160xf32>
    %87 = arith.maximumf %85, %86 : vector<14x160xf32>
    %c0_91 = arith.constant 0 : index
    %c0_92 = arith.constant 0 : index
    %c0_93 = arith.constant 0 : index
    %88 = vector.load %arg10[%c0_91, %c0_92, %c0_93] : memref<2x160x80xf32, #tpu.memory_space<vmem>>, vector<1x160x80xf32>
    %89 = vector.shape_cast %88 : vector<1x160x80xf32> to vector<160x80xf32>
    %cst_94 = arith.constant dense<0.000000e+00> : vector<14x80xf32>
    %90 = tpu.matmul %87, %89, %cst_94 {dimension_numbers = #tpu.dot_dimension_numbers<[1], [0], [0], [1], [0, 0, 1, 1], [], []>} : vector<14x160xf32>, vector<160x80xf32>, vector<14x80xf32> -> vector<14x80xf32>
    %c1_95 = arith.constant 1 : index
    %c0_96 = arith.constant 0 : index
    %c0_97 = arith.constant 0 : index
    %91 = vector.load %arg10[%c1_95, %c0_96, %c0_97] : memref<2x160x80xf32, #tpu.memory_space<vmem>>, vector<1x160x80xf32>
    %92 = vector.shape_cast %91 : vector<1x160x80xf32> to vector<160x80xf32>
    %cst_98 = arith.constant dense<0.000000e+00> : vector<14x80xf32>
    %93 = tpu.matmul %87, %92, %cst_98 {dimension_numbers = #tpu.dot_dimension_numbers<[1], [0], [0], [1], [0, 0, 1, 1], [], []>} : vector<14x160xf32>, vector<160x80xf32>, vector<14x80xf32> -> vector<14x80xf32>
    %94 = arith.maximumf %90, %93 : vector<14x80xf32>
    %c0_99 = arith.constant 0 : index
    %c0_100 = arith.constant 0 : index
    %c0_101 = arith.constant 0 : index
    %95 = vector.load %arg11[%c0_99, %c0_100, %c0_101] : memref<2x5x14xf32, #tpu.memory_space<vmem>>, vector<1x5x14xf32>
    %96 = vector.shape_cast %95 : vector<1x5x14xf32> to vector<5x14xf32>
    %cst_102 = arith.constant dense<0.000000e+00> : vector<5x80xf32>
    %97 = tpu.matmul %96, %94, %cst_102 {dimension_numbers = #tpu.dot_dimension_numbers<[1], [0], [0], [1], [0, 0, 1, 1], [], []>} : vector<5x14xf32>, vector<14x80xf32>, vector<5x80xf32> -> vector<5x80xf32>
    %c1_103 = arith.constant 1 : index
    %c0_104 = arith.constant 0 : index
    %c0_105 = arith.constant 0 : index
    %98 = vector.load %arg11[%c1_103, %c0_104, %c0_105] : memref<2x5x14xf32, #tpu.memory_space<vmem>>, vector<1x5x14xf32>
    %99 = vector.shape_cast %98 : vector<1x5x14xf32> to vector<5x14xf32>
    %cst_106 = arith.constant dense<0.000000e+00> : vector<5x80xf32>
    %100 = tpu.matmul %99, %94, %cst_106 {dimension_numbers = #tpu.dot_dimension_numbers<[1], [0], [0], [1], [0, 0, 1, 1], [], []>} : vector<5x14xf32>, vector<14x80xf32>, vector<5x80xf32> -> vector<5x80xf32>
    %101 = arith.maximumf %97, %100 : vector<5x80xf32>
    %c0_107 = arith.constant 0 : index
    %c0_108 = arith.constant 0 : index
    %102 = vector.load %arg13[%c0_107, %c0_108] : memref<1x120xf32, #tpu.memory_space<vmem>>, vector<1x120xf32>
    %103 = vector.extract_strided_slice %101 {offsets = [0, 0], sizes = [1, 80], strides = [1, 1]} : vector<5x80xf32> to vector<1x80xf32>
    %c0_109 = arith.constant 0 : index
    %c0_110 = arith.constant 0 : index
    %c0_111 = arith.constant 0 : index
    %104 = vector.load %arg12[%c0_109, %c0_110, %c0_111] : memref<5x80x120xf32, #tpu.memory_space<vmem>>, vector<1x80x120xf32>
    %105 = vector.shape_cast %104 : vector<1x80x120xf32> to vector<80x120xf32>
    %cst_112 = arith.constant dense<0.000000e+00> : vector<1x120xf32>
    %106 = tpu.matmul %103, %105, %cst_112 {dimension_numbers = #tpu.dot_dimension_numbers<[1], [0], [0], [1], [0, 0, 1, 1], [], []>} : vector<1x80xf32>, vector<80x120xf32>, vector<1x120xf32> -> vector<1x120xf32>
    %107 = arith.addf %102, %106 : vector<1x120xf32>
    %108 = vector.extract_strided_slice %101 {offsets = [1, 0], sizes = [1, 80], strides = [1, 1]} : vector<5x80xf32> to vector<1x80xf32>
    %c1_113 = arith.constant 1 : index
    %c0_114 = arith.constant 0 : index
    %c0_115 = arith.constant 0 : index
    %109 = vector.load %arg12[%c1_113, %c0_114, %c0_115] : memref<5x80x120xf32, #tpu.memory_space<vmem>>, vector<1x80x120xf32>
    %110 = vector.shape_cast %109 : vector<1x80x120xf32> to vector<80x120xf32>
    %cst_116 = arith.constant dense<0.000000e+00> : vector<1x120xf32>
    %111 = tpu.matmul %108, %110, %cst_116 {dimension_numbers = #tpu.dot_dimension_numbers<[1], [0], [0], [1], [0, 0, 1, 1], [], []>} : vector<1x80xf32>, vector<80x120xf32>, vector<1x120xf32> -> vector<1x120xf32>
    %112 = arith.addf %107, %111 : vector<1x120xf32>
    %113 = vector.extract_strided_slice %101 {offsets = [2, 0], sizes = [1, 80], strides = [1, 1]} : vector<5x80xf32> to vector<1x80xf32>
    %c2_117 = arith.constant 2 : index
    %c0_118 = arith.constant 0 : index
    %c0_119 = arith.constant 0 : index
    %114 = vector.load %arg12[%c2_117, %c0_118, %c0_119] : memref<5x80x120xf32, #tpu.memory_space<vmem>>, vector<1x80x120xf32>
    %115 = vector.shape_cast %114 : vector<1x80x120xf32> to vector<80x120xf32>
    %cst_120 = arith.constant dense<0.000000e+00> : vector<1x120xf32>
    %116 = tpu.matmul %113, %115, %cst_120 {dimension_numbers = #tpu.dot_dimension_numbers<[1], [0], [0], [1], [0, 0, 1, 1], [], []>} : vector<1x80xf32>, vector<80x120xf32>, vector<1x120xf32> -> vector<1x120xf32>
    %117 = arith.addf %112, %116 : vector<1x120xf32>
    %118 = vector.extract_strided_slice %101 {offsets = [3, 0], sizes = [1, 80], strides = [1, 1]} : vector<5x80xf32> to vector<1x80xf32>
    %c3_121 = arith.constant 3 : index
    %c0_122 = arith.constant 0 : index
    %c0_123 = arith.constant 0 : index
    %119 = vector.load %arg12[%c3_121, %c0_122, %c0_123] : memref<5x80x120xf32, #tpu.memory_space<vmem>>, vector<1x80x120xf32>
    %120 = vector.shape_cast %119 : vector<1x80x120xf32> to vector<80x120xf32>
    %cst_124 = arith.constant dense<0.000000e+00> : vector<1x120xf32>
    %121 = tpu.matmul %118, %120, %cst_124 {dimension_numbers = #tpu.dot_dimension_numbers<[1], [0], [0], [1], [0, 0, 1, 1], [], []>} : vector<1x80xf32>, vector<80x120xf32>, vector<1x120xf32> -> vector<1x120xf32>
    %122 = arith.addf %117, %121 : vector<1x120xf32>
    %123 = vector.extract_strided_slice %101 {offsets = [4, 0], sizes = [1, 80], strides = [1, 1]} : vector<5x80xf32> to vector<1x80xf32>
    %c4_125 = arith.constant 4 : index
    %c0_126 = arith.constant 0 : index
    %c0_127 = arith.constant 0 : index
    %124 = vector.load %arg12[%c4_125, %c0_126, %c0_127] : memref<5x80x120xf32, #tpu.memory_space<vmem>>, vector<1x80x120xf32>
    %125 = vector.shape_cast %124 : vector<1x80x120xf32> to vector<80x120xf32>
    %cst_128 = arith.constant dense<0.000000e+00> : vector<1x120xf32>
    %126 = tpu.matmul %123, %125, %cst_128 {dimension_numbers = #tpu.dot_dimension_numbers<[1], [0], [0], [1], [0, 0, 1, 1], [], []>} : vector<1x80xf32>, vector<80x120xf32>, vector<1x120xf32> -> vector<1x120xf32>
    %127 = arith.addf %122, %126 : vector<1x120xf32>
    %cst_129 = arith.constant 0.000000e+00 : f32
    %128 = vector.broadcast %cst_129 : f32 to vector<1x120xf32>
    %129 = arith.maximumf %127, %128 : vector<1x120xf32>
    %c0_130 = arith.constant 0 : index
    %c0_131 = arith.constant 0 : index
    %130 = vector.load %arg14[%c0_130, %c0_131] : memref<120x84xf32, #tpu.memory_space<vmem>>, vector<120x84xf32>
    %cst_132 = arith.constant dense<0.000000e+00> : vector<1x84xf32>
    %131 = tpu.matmul %129, %130, %cst_132 {dimension_numbers = #tpu.dot_dimension_numbers<[1], [0], [0], [1], [0, 0, 1, 1], [], []>} : vector<1x120xf32>, vector<120x84xf32>, vector<1x84xf32> -> vector<1x84xf32>
    %c0_133 = arith.constant 0 : index
    %c0_134 = arith.constant 0 : index
    %132 = vector.load %arg15[%c0_133, %c0_134] : memref<1x84xf32, #tpu.memory_space<vmem>>, vector<1x84xf32>
    %133 = arith.addf %131, %132 : vector<1x84xf32>
    %cst_135 = arith.constant 0.000000e+00 : f32
    %134 = vector.broadcast %cst_135 : f32 to vector<1x84xf32>
    %135 = arith.maximumf %133, %134 : vector<1x84xf32>
    %c0_136 = arith.constant 0 : index
    %c0_137 = arith.constant 0 : index
    %136 = vector.load %arg16[%c0_136, %c0_137] : memref<84x10xf32, #tpu.memory_space<vmem>>, vector<84x10xf32>
    %cst_138 = arith.constant dense<0.000000e+00> : vector<1x10xf32>
    %137 = tpu.matmul %135, %136, %cst_138 {dimension_numbers = #tpu.dot_dimension_numbers<[1], [0], [0], [1], [0, 0, 1, 1], [], []>} : vector<1x84xf32>, vector<84x10xf32>, vector<1x10xf32> -> vector<1x10xf32>
    %c0_139 = arith.constant 0 : index
    %c0_140 = arith.constant 0 : index
    %138 = vector.load %arg17[%c0_139, %c0_140] : memref<1x10xf32, #tpu.memory_space<vmem>>, vector<1x10xf32>
    %139 = arith.addf %137, %138 : vector<1x10xf32>
    %c0_141 = arith.constant 0 : index
    %c0_142 = arith.constant 0 : index
    %c0_143 = arith.constant 0 : index
    %140 = vector.load %arg18[%c0_141, %c0_142, %c0_143] : memref<1x1x10xf32, #tpu.memory_space<vmem>>, vector<1x1x10xf32>
    %141 = vector.shape_cast %140 : vector<1x1x10xf32> to vector<1x10xf32>
    %142 = vector.shape_cast %139 : vector<1x10xf32> to vector<1x1x10xf32>
    tpu.vector_store %arg18[%c0_141, %c0_142, %c0_143], %142 {strides = array<i32>} : memref<1x1x10xf32, #tpu.memory_space<vmem>>, vector<1x1x10xf32>,
    return
  }
  func.func @transform_0(%arg0: i32) -> (i32, i32, i32) {
    %c0_i32 = arith.constant 0 : i32
    %c0_i32_0 = arith.constant 0 : i32
    %c0_i32_1 = arith.constant 0 : i32
    return %arg0, %c0_i32, %c0_i32_0 : i32, i32, i32
  }
  func.func @transform_1(%arg0: i32) -> (i32, i32, i32) {
    %c0_i32 = arith.constant 0 : i32
    %c0_i32_0 = arith.constant 0 : i32
    %c0_i32_1 = arith.constant 0 : i32
    %c0_i32_2 = arith.constant 0 : i32
    return %c0_i32, %c0_i32_0, %c0_i32_1 : i32, i32, i32
  }
  func.func @transform_2(%arg0: i32) -> (i32, i32, i32) {
    %c0_i32 = arith.constant 0 : i32
    %c0_i32_0 = arith.constant 0 : i32
    %c0_i32_1 = arith.constant 0 : i32
    %c0_i32_2 = arith.constant 0 : i32
    return %c0_i32, %c0_i32_0, %c0_i32_1 : i32, i32, i32
  }
  func.func @transform_3(%arg0: i32) -> (i32, i32) {
    %c0_i32 = arith.constant 0 : i32
    %c0_i32_0 = arith.constant 0 : i32
    %c0_i32_1 = arith.constant 0 : i32
    return %c0_i32, %c0_i32_0 : i32, i32
  }
  func.func @transform_4(%arg0: i32) -> (i32, i32, i32) {
    %c0_i32 = arith.constant 0 : i32
    %c0_i32_0 = arith.constant 0 : i32
    %c0_i32_1 = arith.constant 0 : i32
    %c0_i32_2 = arith.constant 0 : i32
    return %c0_i32, %c0_i32_0, %c0_i32_1 : i32, i32, i32
  }
  func.func @transform_5(%arg0: i32) -> (i32, i32, i32) {
    %c0_i32 = arith.constant 0 : i32
    %c0_i32_0 = arith.constant 0 : i32
    %c0_i32_1 = arith.constant 0 : i32
    %c0_i32_2 = arith.constant 0 : i32
    return %c0_i32, %c0_i32_0, %c0_i32_1 : i32, i32, i32
  }
  func.func @transform_6(%arg0: i32) -> (i32, i32, i32) {
    %c0_i32 = arith.constant 0 : i32
    %c0_i32_0 = arith.constant 0 : i32
    %c0_i32_1 = arith.constant 0 : i32
    %c0_i32_2 = arith.constant 0 : i32
    return %c0_i32, %c0_i32_0, %c0_i32_1 : i32, i32, i32
  }
  func.func @transform_7(%arg0: i32) -> (i32, i32, i32) {
    %c0_i32 = arith.constant 0 : i32
    %c0_i32_0 = arith.constant 0 : i32
    %c0_i32_1 = arith.constant 0 : i32
    %c0_i32_2 = arith.constant 0 : i32
    return %c0_i32, %c0_i32_0, %c0_i32_1 : i32, i32, i32
  }
  func.func @transform_8(%arg0: i32) -> (i32, i32) {
    %c0_i32 = arith.constant 0 : i32
    %c0_i32_0 = arith.constant 0 : i32
    %c0_i32_1 = arith.constant 0 : i32
    return %c0_i32, %c0_i32_0 : i32, i32
  }
  func.func @transform_9(%arg0: i32) -> (i32, i32, i32) {
    %c0_i32 = arith.constant 0 : i32
    %c0_i32_0 = arith.constant 0 : i32
    %c0_i32_1 = arith.constant 0 : i32
    %c0_i32_2 = arith.constant 0 : i32
    return %c0_i32, %c0_i32_0, %c0_i32_1 : i32, i32, i32
  }
  func.func @transform_10(%arg0: i32) -> (i32, i32, i32) {
    %c0_i32 = arith.constant 0 : i32
    %c0_i32_0 = arith.constant 0 : i32
    %c0_i32_1 = arith.constant 0 : i32
    %c0_i32_2 = arith.constant 0 : i32
    return %c0_i32, %c0_i32_0, %c0_i32_1 : i32, i32, i32
  }
  func.func @transform_11(%arg0: i32) -> (i32, i32, i32) {
    %c0_i32 = arith.constant 0 : i32
    %c0_i32_0 = arith.constant 0 : i32
    %c0_i32_1 = arith.constant 0 : i32
    %c0_i32_2 = arith.constant 0 : i32
    return %c0_i32, %c0_i32_0, %c0_i32_1 : i32, i32, i32
  }
  func.func @transform_12(%arg0: i32) -> (i32, i32) {
    %c0_i32 = arith.constant 0 : i32
    %c0_i32_0 = arith.constant 0 : i32
    %c0_i32_1 = arith.constant 0 : i32
    return %c0_i32, %c0_i32_0 : i32, i32
  }
  func.func @transform_13(%arg0: i32) -> (i32, i32) {
    %c0_i32 = arith.constant 0 : i32
    %c0_i32_0 = arith.constant 0 : i32
    %c0_i32_1 = arith.constant 0 : i32
    return %c0_i32, %c0_i32_0 : i32, i32
  }
  func.func @transform_14(%arg0: i32) -> (i32, i32) {
    %c0_i32 = arith.constant 0 : i32
    %c0_i32_0 = arith.constant 0 : i32
    %c0_i32_1 = arith.constant 0 : i32
    return %c0_i32, %c0_i32_0 : i32, i32
  }
  func.func @transform_15(%arg0: i32) -> (i32, i32) {
    %c0_i32 = arith.constant 0 : i32
    %c0_i32_0 = arith.constant 0 : i32
    %c0_i32_1 = arith.constant 0 : i32
    return %c0_i32, %c0_i32_0 : i32, i32
  }
  func.func @transform_16(%arg0: i32) -> (i32, i32) {
    %c0_i32 = arith.constant 0 : i32
    %c0_i32_0 = arith.constant 0 : i32
    %c0_i32_1 = arith.constant 0 : i32
    return %c0_i32, %c0_i32_0 : i32, i32
  }
  func.func @transform_17(%arg0: i32) -> (i32, i32, i32) {
    %c0_i32 = arith.constant 0 : i32
    %c0_i32_0 = arith.constant 0 : i32
    %c0_i32_1 = arith.constant 0 : i32
    return %arg0, %c0_i32, %c0_i32_0 : i32, i32, i32
  }
}

</mosaic_0001>

<bundles_post_ra>
// kernel: lenet5_forward.1
= control target key start
LH: loop header
LB: loop body
LE: loop exit
PB: predicated region body
PF: predicated region fallthrough
CT: control target
= control target key end

     0   :  { %s6480_s0 = inlined_call_operand.vmem [shape: f32[2,32,32], index: 0, kind: input, shape index: {}]   ;;  %s6481_s1 = inlined_call_operand.vmem [shape: f32[5,32,32], index: 1, kind: input, shape index: {}]   ;;  %s6482_s2 = inlined_call_operand.vmem [shape: f32[5,32,168], index: 2, kind: input, shape index: {}]   ;;  %s6483_s3 = inlined_call_operand.vmem [shape: f32[1,168], index: 3, kind: input, shape index: {}]   ;;  %s6484_s4 = inlined_call_operand.vmem [shape: f32[2,168,84], index: 4, kind: input, shape index: {}]   ;;  %s6485_s5 = inlined_call_operand.vmem [shape: f32[2,14,32], index: 5, kind: input, shape index: {}]   ;;  %s6486_s6 = inlined_call_operand.vmem [shape: f32[5,14,14], index: 6, kind: input, shape index: {}]   ;;  %s6487_s7 = inlined_call_operand.vmem [shape: f32[5,84,160], index: 7, kind: input, shape index: {}]   ;;  %s6488_s8 = inlined_call_operand.vmem [shape: f32[1,160], index: 8, kind: input, shape index: {}]   ;;  %s6489_s9 = inlined_call_operand.vmem [shape: f32[2,160,80], index: 9, kind: input, shape index: {}]   ;;  %s6490_s10 = inlined_call_operand.vmem [shape: f32[2,5,14], index: 10, kind: input, shape index: {}]   ;;  %s6491_s11 = inlined_call_operand.vmem [shape: f32[5,80,120], index: 11, kind: input, shape index: {}]   ;;  %s6492_s12 = inlined_call_operand.vmem [shape: f32[1,120], index: 12, kind: input, shape index: {}]   ;;  %s6493_s13 = inlined_call_operand.vmem [shape: f32[120,84], index: 13, kind: input, shape index: {}]   ;;  %s6494_s14 = inlined_call_operand.vmem [shape: f32[1,84], index: 14, kind: input, shape index: {}]   ;;  %s6495_s15 = inlined_call_operand.vmem [shape: f32[84,10], index: 15, kind: input, shape index: {}]   ;;  %s6496_s16 = inlined_call_operand.vmem [shape: f32[1,10], index: 16, kind: input, shape index: {}]   ;;  %s6497_s17 = inlined_call_operand.hbm [shape: f32[2,1,10], index: 17, kind: output, shape index: {}]  }
   0x1   :  { %6506 = sst [smem:[#allocation11_spill]] %s6480_s0 }
   0x2   :  { %6507 = sst [smem:[#allocation12_spill]] %s6481_s1 }
   0x3   :  { %6508 = sst [smem:[#allocation13_spill]] %s6496_s16 }
   0x4   :  { %6509 = sst [smem:[#allocation14_spill]] %s6497_s17 }
   0x5   :  { %22 = vsyncpa [#allocation3], 0 }
   0x6   :  { %24 = vsyncpa [#allocation3 + $0x1], 0  ;;  %s4892_s24 = smov 0   ;;  %s4894_s25 = smov 0  }
   0x7   :  { %s4896_s26 = smov 0   ;;  %s4898_s27 = smov 0  }
   0x8 LB: > { %6510 = sst [smem:[#allocation5_spill]] %s4785_s24  ;;  %s4913_s28 = sadd.s32 4294967295, %s4797_s27   ;;  %s4797_s27 = sphi %s4898_s27, %s6525_s27   ;;  %s4793_s26 = sphi %s4896_s26, %s6530_s26   ;;  %s4789_s25 = sphi %s4894_s25, %s6529_s25   ;;  %s4785_s24 = sphi %s4892_s24, %s6528_s24  }
   0x9   : > { %6511 = sst [smem:[#allocation6_spill]] %s4793_s26  ;;  %s3920_s29 = sadd.s32 4294967294, %s4797_s27  }
   0xa   : > { %6512 = sst [smem:[#allocation7_spill]] %s4797_s27  ;;  %s4917_s0 = sadd.s32 1, %s4797_s27  }
   0xb   : > { %6513 = sst [smem:[#allocation8_spill]] %s4917_s0  ;;  %s399_s30 = sadd.s32 1, %s4793_s26 }
   0xc   : > { %s396_s18 = ssub.s32 %s4797_s27, %s4917_s0  ;;  %p409_p0 = scmp.ne.s32.totalorder %s4793_s26, %s4789_s25 }
   0xd   : > { %p397_p1 = scmp.eq.s32.totalorder %s396_s18, 0  ;;  %p410_p2 = scmp.eq.s32.totalorder %s4913_s28, 1 }
   0xe   : > { %p415_p3 = scmp.ne.s32.totalorder %s4789_s25, %s4785_s24  ;;  %p416_p4 = scmp.eq.s32.totalorder %s3920_s29, 1 }
   0xf   : > { %s4928_s19 = scalar_select %p397_p1, %s4793_s26, %s399_s30  }
  0x10   : > { %p4930_p5 = por %p410_p2, %p409_p0  ;;  %p4934_p6 = por %p416_p4, %p415_p3 }
  0x11   : > { %6514 = sst [smem:[#allocation9_spill]] %s4928_s19  ;;  %p3923_p7 = scmp.ge.s32.totalorder %s4797_s27, 1 }
  0x12   : > { %s6516_s20 = scalar_select %p4934_p6, 1, 0 }
  0x13   : > { %p490_p8 = scmp.lt.s32.totalorder %s4797_s27, 3 }
  0x14   : > { %6517 = sst [smem:[#allocation10_spill]] %s6516_s20 }
  0x15   : > { %p491_p9 = pnand %p3923_p7, %p490_p8 }
  0x16   : > { %p541_p10 = scmp.lt.s32.totalorder (!%p491_p9), %s4913_s28, 1  ;;  %s6518_s23 = sld [smem:[#allocation12_spill]] (!%p491_p9) }
  0x17   : > { %494 = sbr.rel (%p491_p9) target bundleno = 3133 (0xc3d), region = 88  ;;  %s6519_s16 = sld [smem:[#allocation11_spill]] (!%p491_p9) }
  0x18   : > { %s539_s22 = sand.u32 (!%p491_p9), 1, %s4789_s25   ;;  %s6521_s19 = sld [smem:[#allocation14_spill]] (!%p491_p9) }
  0x19   : > { %s540_s17 = scalar_lea.vmem (!%p491_p9), [#allocation2], %s539_s22 }
  0x1c   : > { %v3926_v0 = vld [vmem:[%s6518_s23 + $0x20] sm:$0xff]  ;;  %vm563_vm0 = vcmask 261120   ;;  %v3941_v1 = vld [vmem:[%s6482_s2 + $0x78] sm:$0xff]  ;;  %s542_s18 = scalar_select %p541_p10, %s4913_s28, 1  ;;  %v3940_v2 = vld [vmem:[%s6482_s2 + $0x70] sm:$0xff]  ;;  %v4799_v24 = vmov 0.0  }
  0x1d   : > { %4411 = vmatprep.mubr.msk.f32.mxu0 %vm563_vm0, %v3926_v0  ;;  %706 = vmatprep.subr.mxu1 %v3941_v1  ;;  %v3939_v3 = vld [vmem:[%s6482_s2 + $0x68] sm:$0xff]  ;;  %v3938_v4 = vld [vmem:[%s6482_s2 + $0x60] sm:$0xff]  ;;  %v3937_v5 = vld [vmem:[%s6482_s2 + $0x58] sm:$0xff]  ;;  %vm1581_vm1 = vcmask 326656   ;;  %vm2100_vm2 = vcmask 1043456   ;;  %vm1984_vm3 = vcmask 113664  }
  0x1e   : > { %707 = vmatpush1.msra.mxu1 %v3940_v2  ;;  %s4253_s24 = sshll.u32 %s542_s18, 5  ;;  %v3927_v10 = vld [vmem:[%s6518_s23 + $0x28] sm:$0xff]  ;;  %v557_v11 = vld [vmem:[%s6482_s2 + $0x38] sm:$0xff]  ;;  %v3928_v12 = vld [vmem:[%s6518_s23 + $0x30] sm:$0xff]  ;;  %746 = vmatprep.mubr.f32.mxu1 %v4799_v24  ;;  %vm1991_vm4 = vcmask 1045504   ;;  %vm2093_vm5 = vcmask 687104  }
  0x1f   : > { %708 = vmatprep.subr.mxu1 %v3939_v3  ;;  %s545_s26 = scalar_lea.vmem %s6519_s16, %s4253_s24  ;;  %v556_v13 = vld [vmem:[%s6482_s2 + $0x30] sm:$0xff]  ;;  %v555_v14 = vld [vmem:[%s6482_s2 + $0x28] sm:$0xff]  ;;  %v554_v15 = vld [vmem:[%s6482_s2 + $0x20] sm:$0xff]  ;;  %vm4800_vm6 = vmmov 0   ;;  %vm3255_vm7 = vcmask 654336   ;;  %vm3687_vm8 = vcmask 982016  }
  0x20   : > { %709 = vmatpush1.msra.mxu1 %v3938_v4  ;;  %v4964_v6 = vld [vmem:[%s545_s26 + $0x18] sm:$0xff]  ;;  %v4966_v7 = vld [vmem:[%s545_s26 + $0x10] sm:$0xff]  ;;  %v4970_v8 = vld [vmem:[%s545_s26 + $0x8] sm:$0xff]  ;;  %s4250_s16 = sshll.u32 %s4913_s28, 4  ;;  %s3865_s24 = sshll.u32 %s540_s17, 4  ;;  %vm3850_vm9 = vcmask 73728   ;;  %s3866_s24 = int_to_ptr.vmem [resolvable:$true] %s3865_s24 }
  0x21   : > { %710 = vmatprep.subr.mxu1 %v3937_v5  ;;  %4403 = vmatprep.subr.mxu0 %v4964_v6  ;;  %v4974_v9 = vld [vmem:[%s545_s26] sm:$0xff]  ;;  %v3929_v16 = vld [vmem:[%s6518_s23 + $0x38] sm:$0xff]  ;;  %v3936_v18 = vld [vmem:[%s6482_s2 + $0x50] sm:$0xff]  ;;  %s6520_s26 = sld [smem:[#allocation13_spill]]  ;;  %s6445_s20 = scalar_lea.hbm %s6521_s19, %s4250_s16 }
  0x22   : > { %4404 = vmatpush3.msra.mxu0 %v4964_v6  ;;  %v553_v17 = vld [vmem:[%s6482_s2 + $0x18] sm:$0xff]  ;;  %v552_v19 = vld [vmem:[%s6482_s2 + $0x10] sm:$0xff]  ;;  %711 = vmatpush1.msra.mxu1 %v3936_v18  ;;  %v3935_v20 = vld [vmem:[%s6482_s2 + $0x48] sm:$0xff]  ;;  %s3853_s18 = scalar_lea.sflag [#allocation3], %s539_s22  ;;  %s4737_s21 = scalar_lea.vmem %s3866_s24, 16 }
  0x23   : > { %4405 = vmatprep.subr.mxu0 %v4966_v7  ;;  %v551_v21 = vld [vmem:[%s6482_s2 + $0x8] sm:$0xff]  ;;  %712 = vmatprep.subr.mxu1 %v3935_v20  ;;  %v3934_v22 = vld [vmem:[%s6482_s2 + $0x40] sm:$0xff]  ;;  %v3952_v31 = vld [vmem:[%s6518_s23 + $0x50] sm:$0xff]  ;;  %p4738_p11 = scmp.ne.s32.totalorder %s3866_s24, %s4737_s21  ;;  %s4801_s28 = smov [#allocation2]  }
  0x24   : > { %4406 = vmatpush3.msra.mxu0 %v4966_v7  ;;  %v550_v23 = vld [vmem:[%s6482_s2] sm:$0xff]  ;;  %713 = vmatpush1.msra.mxu1 %v3934_v22  ;;  %v3951_v30 = vld [vmem:[%s6518_s23 + $0x48] sm:$0xff]  ;;  %v3953_v32 = vld [vmem:[%s6518_s23 + $0x58] sm:$0xff]  ;;  %s4741_s29 = sshll.u32 %s4801_s28, 4  ;;  %s4742_s29 = int_to_ptr.vmem [resolvable:$false] %s4741_s29 }
  0x25   : > { %4407 = vmatprep.subr.mxu0 %v4970_v8  ;;  %4417 = vmatprep.subr.mxu1 %v4964_v6  ;;  %v3950_v29 = vld [vmem:[%s6518_s23 + $0x40] sm:$0xff]  ;;  %v3971_v34 = vld [vmem:[%s6518_s23 + $0x68] sm:$0xff]  ;;  %v3972_v35 = vld [vmem:[%s6518_s23 + $0x70] sm:$0xff]  ;;  %p4739_p12 = pnand %p4738_p11, %p4930_p5  ;;  %s4743_s30 = scalar_lea.vmem %s4742_s29, 32 }
  0x26   : > { %4408 = vmatpush3.msra.mxu0 %v4970_v8  ;;  %v3970_v33 = vld [vmem:[%s6518_s23 + $0x60] sm:$0xff]  ;;  %v3973_v36 = vld [vmem:[%s6518_s23 + $0x78] sm:$0xff]  ;;  %v3964_v38 = vld [vmem:[%s6482_s2 + $0xb0] sm:$0xff]  ;;  %p4744_p0 = scmp.lt.s32.totalorder %s3866_s24, %s4742_s29  ;;  %p4745_p1 = scmp.lt.s32.totalorder %s4743_s30, %s4737_s21 }
  0x27   : > { %4409 = vmatprep.subr.mxu0 %v4974_v9  ;;  %v3965_v37 = vld [vmem:[%s6482_s2 + $0xb8] sm:$0xff]  ;;  %v3963_v39 = vld [vmem:[%s6482_s2 + $0xa8] sm:$0xff]  ;;  %v3962_v40 = vld [vmem:[%s6482_s2 + $0xa0] sm:$0xff]  ;;  %p4740_p13 = pneg %p4739_p12 }
  0x28   : > { %4410 = vmatpush3.msra.mxu0 %v4974_v9  ;;  %v3961_v41 = vld [vmem:[%s6482_s2 + $0x98] sm:$0xff]  ;;  %v3960_v42 = vld [vmem:[%s6482_s2 + $0x90] sm:$0xff]  ;;  %v3959_v43 = vld [vmem:[%s6482_s2 + $0x88] sm:$0xff]  ;;  %p4746_p2 = por %p4745_p1, %p4744_p0 }
  0x29   : > { %4412 = vmatmul.mubr.msk.f32.vlgmr.msra.gmra.mxu0 %vm563_vm0, %v3927_v10  ;;  %807 = vmatprep.subr.mxu0 %v557_v11  ;;  %v3958_v44 = vld [vmem:[%s6482_s2 + $0x80] sm:$0xff]  ;;  %v3985_v45 = vld [vmem:[%s6482_s2 + $0xf8] sm:$0xff]  ;;  %v3984_v46 = vld [vmem:[%s6482_s2 + $0xf0] sm:$0xff] }
  0x2a   : > { %4414 = vmatprep.mubr.msk.f32.mxu0 %vm563_vm0, %v3928_v12  ;;  %808 = vmatpush1.msra.mxu0 %v556_v13  ;;  %v3983_v47 = vld [vmem:[%s6482_s2 + $0xe8] sm:$0xff]  ;;  %v3982_v48 = vld [vmem:[%s6482_s2 + $0xe0] sm:$0xff]  ;;  %v3981_v49 = vld [vmem:[%s6482_s2 + $0xd8] sm:$0xff]  ;;  %p4747_p3 = pnand %p4746_p2, %p4740_p13 }
  0x2b   : > { %809 = vmatprep.subr.mxu0 %v555_v14  ;;  %v3980_v50 = vld [vmem:[%s6482_s2 + $0xd0] sm:$0xff]  ;;  %v3979_v51 = vld [vmem:[%s6482_s2 + $0xc8] sm:$0xff]  ;;  %v3978_v52 = vld [vmem:[%s6482_s2 + $0xc0] sm:$0xff] }
  0x2c   : > { %810 = vmatpush1.msra.mxu0 %v554_v15  ;;  %v3990_v4 = vld [vmem:[%s6518_s23 + $0x80] sm:$0xff]  ;;  %v4004_v10 = vld [vmem:[%s6482_s2 + $0x130] sm:$0xff]  ;;  %v4003_v11 = vld [vmem:[%s6482_s2 + $0x128] sm:$0xff] }
  0x2d   : > { %4415 = vmatmul.mubr.msk.f32.gmra.mxu0 %vm563_vm0, %v3929_v16  ;;  %811 = vmatprep.subr.mxu0 %v553_v17  ;;  %v4002_v12 = vld [vmem:[%s6482_s2 + $0x120] sm:$0xff]  ;;  %v4001_v13 = vld [vmem:[%s6482_s2 + $0x118] sm:$0xff]  ;;  %v4000_v14 = vld [vmem:[%s6482_s2 + $0x110] sm:$0xff] }
  0x2e   : > { %812 = vmatpush1.msra.mxu0 %v552_v19  ;;  %847 = vmatprep.mubr.f32.mxu0 %v4799_v24  ;;  %v3999_v15 = vld [vmem:[%s6482_s2 + $0x108] sm:$0xff]  ;;  %v3998_v16 = vld [vmem:[%s6482_s2 + $0x100] sm:$0xff]  ;;  %v1575_v17 = vld [vmem:[%s6484_s4 + $0x78] sm:$0xff] }
  0x2f   : > { %813 = vmatprep.subr.mxu0 %v551_v21  ;;  %v1574_v18 = vld [vmem:[%s6484_s4 + $0x70] sm:$0xff]  ;;  %v1573_v19 = vld [vmem:[%s6484_s4 + $0x68] sm:$0xff]  ;;  %v1572_v20 = vld [vmem:[%s6484_s4 + $0x60] sm:$0xff] }
  0x30   : > { %814 = vmatpush1.msra.mxu0 %v550_v23  ;;  %v1571_v21 = vld [vmem:[%s6484_s4 + $0x58] sm:$0xff]  ;;  %v1570_v22 = vld [vmem:[%s6484_s4 + $0x50] sm:$0xff]  ;;  %v1569_v23 = vld [vmem:[%s6484_s4 + $0x48] sm:$0xff] }
  0x31   : > { %3946 = vmatmul.mubr.msk.f32.vlgmr.msra.gmra.mxu0 %vm563_vm0, %v4974_v9  ;;  %1019 = vmatprep.subr.mxu0 %v3965_v37 }
  0x32   : > { %853 = vmatprep.mubr.f32.mxu0 %v4799_v24  ;;  %1020 = vmatpush1.msra.mxu0 %v3964_v38 }
  0x33   : > { %1021 = vmatprep.subr.mxu0 %v3963_v39 }
  0x34   : > { %1022 = vmatpush1.msra.mxu0 %v3962_v40 }
  0x35   : > { %3947 = vmatmul.mubr.msk.f32.gmra.mxu0 %vm563_vm0, %v4970_v8  ;;  %1023 = vmatprep.subr.mxu0 %v3961_v41 }
  0x36   : > { %859 = vmatprep.mubr.f32.mxu0 %v4799_v24  ;;  %1024 = vmatpush1.msra.mxu0 %v3960_v42 }
  0x37   : > { %1025 = vmatprep.subr.mxu0 %v3959_v43 }
  0x38   : > { %1026 = vmatpush1.msra.mxu0 %v3958_v44 }
  0x39   : > { %3948 = vmatmul.mubr.msk.f32.gmra.mxu0 %vm563_vm0, %v4966_v7  ;;  %4445 = vmatprep.subr.mxu0 %v4964_v6 }
  0x3a   : > { %865 = vmatprep.mubr.f32.mxu0 %v4799_v24 }
  0x3d   : > { %3949 = vmatmul.mubr.msk.f32.gmra.mxu0 %vm563_vm0, %v4964_v6 }
  0x3e   : > { %1059 = vmatprep.mubr.f32.mxu0 %v4799_v24 }
  0xe9   : > { %v4413_v25 = vpop.f32.mrf.mxu0 }
  0xeb   : > { %v642_v26 = vpop.f32.mrf.mxu0 }
  0xec   : > { %3942 = vmatmul.mubr.msk.f32.vlgmr.msra.gmra.mxu1 %vm563_vm0, %v642_v26  ;;  %v1567_v26 = vld [vmem:[%s6484_s4 + $0x38] sm:$0xff] }
  0xed   : > { %752 = vmatprep.mubr.f32.mxu1 %v4799_v24  ;;  %4418 = vmatpush3.msra.mxu1 %v4964_v6  ;;  %v4416_v27 = vpop.f32.mrf.mxu0 }
  0xee   : > { %4419 = vmatprep.subr.mxu1 %v4966_v7 }
  0xef   : > { %4420 = vmatpush3.msra.mxu1 %v4966_v7  ;;  %v652_v28 = vpop.f32.mrf.mxu0 }
  0xf0   : > { %3943 = vmatmul.mubr.msk.f32.gmra.mxu1 %vm563_vm0, %v4413_v25  ;;  %4421 = vmatprep.subr.mxu1 %v4970_v8  ;;  %v1568_v25 = vld [vmem:[%s6484_s4 + $0x40] sm:$0xff] }
  0xf1   : > { %758 = vmatprep.mubr.f32.mxu1 %v4799_v24  ;;  %4422 = vmatpush3.msra.mxu1 %v4970_v8 }
  0xf2   : > { %4423 = vmatprep.subr.mxu1 %v4974_v9 }
  0xf3   : > { %4424 = vmatpush3.msra.mxu1 %v4974_v9 }
  0xf4   : > { %3944 = vmatmul.mubr.msk.f32.gmra.mxu1 %vm563_vm0, %v652_v28  ;;  %4431 = vmatprep.subr.mxu1 %v4964_v6  ;;  %v1565_v28 = vld [vmem:[%s6484_s4 + $0x28] sm:$0xff] }
  0xf5   : > { %764 = vmatprep.mubr.f32.mxu1 %v4799_v24 }
  0xf8   : > { %3945 = vmatmul.mubr.msk.f32.gmra.mxu1 %vm563_vm0, %v4416_v27  ;;  %v1566_v27 = vld [vmem:[%s6484_s4 + $0x30] sm:$0xff] }
  0xf9   : > { %4425 = vmatprep.mubr.msk.f32.mxu1 %vm563_vm0, %v3950_v29  ;;  %v1564_v29 = vld [vmem:[%s6484_s4 + $0x20] sm:$0xff] }
  0xfc   : > { %4426 = vmatmul.mubr.msk.f32.vlgmr.msra.gmra.mxu1 %vm563_vm0, %v3951_v30  ;;  %v1563_v30 = vld [vmem:[%s6484_s4 + $0x18] sm:$0xff] }
  0xfd   : > { %4432 = vmatpush3.msra.mxu1 %v4964_v6  ;;  %4428 = vmatprep.mubr.msk.f32.mxu1 %vm563_vm0, %v3952_v31  ;;  %v1562_v31 = vld [vmem:[%s6484_s4 + $0x10] sm:$0xff] }
  0xfe   : > { %4433 = vmatprep.subr.mxu1 %v4966_v7 }
  0xff   : > { %4434 = vmatpush3.msra.mxu1 %v4966_v7 }
 0x100   : > { %4429 = vmatmul.mubr.msk.f32.gmra.mxu1 %vm563_vm0, %v3953_v32  ;;  %4435 = vmatprep.subr.mxu1 %v4970_v8  ;;  %v1561_v32 = vld [vmem:[%s6484_s4 + $0x8] sm:$0xff] }
 0x101   : > { %4436 = vmatpush3.msra.mxu1 %v4970_v8  ;;  %4439 = vmatprep.mubr.msk.f32.mxu1 %vm563_vm0, %v3970_v33  ;;  %v1560_v33 = vld [vmem:[%s6484_s4] sm:$0xff] }
 0x102   : > { %4437 = vmatprep.subr.mxu1 %v4974_v9 }
 0x103   : > { %4438 = vmatpush3.msra.mxu1 %v4974_v9 }
 0x104   : > { %4440 = vmatmul.mubr.msk.f32.vlgmr.msra.gmra.mxu1 %vm563_vm0, %v3971_v34  ;;  %1239 = vmatprep.subr.mxu1 %v3985_v45  ;;  %v849_v34 = vpop.f32.mrf.mxu0 }
 0x105   : > { %4442 = vmatprep.mubr.msk.f32.mxu1 %vm563_vm0, %v3972_v35  ;;  %1240 = vmatpush1.msra.mxu1 %v3984_v46 }
 0x106   : > { %1241 = vmatprep.subr.mxu1 %v3983_v47  ;;  %v851_v35 = vpop.f32.mrf.mxu0 }
 0x107   : > { %1242 = vmatpush1.msra.mxu1 %v3982_v48 }
 0x108   : > { %4443 = vmatmul.mubr.msk.f32.gmra.mxu1 %vm563_vm0, %v3973_v36  ;;  %1243 = vmatprep.subr.mxu1 %v3981_v49  ;;  %v855_v36 = vpop.f32.mrf.mxu0 }
 0x109   : > { %1279 = vmatprep.mubr.f32.mxu1 %v4799_v24  ;;  %1244 = vmatpush1.msra.mxu1 %v3980_v50 }
 0x10a   : > { %1245 = vmatprep.subr.mxu1 %v3979_v51  ;;  %v857_v37 = vpop.f32.mrf.mxu0 }
 0x10b   : > { %1246 = vmatpush1.msra.mxu1 %v3978_v52 }
 0x10c   : > { %1594 = vmatprep.subr.mxu1 %v4799_v24  ;;  %v861_v38 = vpop.f32.mrf.mxu0 }
 0x10e   : > { %v863_v39 = vpop.f32.mrf.mxu0 }
 0x110   : > { %v867_v40 = vpop.f32.mrf.mxu0 }
 0x112   : > { %v869_v41 = vpop.f32.mrf.mxu0 }
 0x1ac   : > { %v5145_v53 = vpop.f32.mrf.mxu1 }
 0x1ad   : > { %v850_v42 = vadd.f32 %v849_v34, %v5145_v53 }
 0x1ae   : > { %v5147_v54 = vpop.f32.mrf.mxu1 }
 0x1af   : > { %v852_v44 = vadd.f32 %v851_v35, %v5147_v54  ;;  %v1534_v35 = vlaneseq }
 0x1b0   : > { %v5149_v55 = vpop.f32.mrf.mxu1 }
 0x1b1   : > { %v856_v47 = vadd.f32 %v855_v36, %v5149_v55 }
 0x1b2   : > { %v5151_v56 = vpop.f32.mrf.mxu1 }
 0x1b3   : > { %v858_v50 = vadd.f32 %v857_v37, %v5151_v56  ;;  %v5421_v37 = vshrl.u32 %v1534_v35, 7  ;;  %v4062_v35 = vld [vmem:[%s6487_s7 + $0x110] sm:$0xff] }
 0x1b4   : > { %v5153_v57 = vpop.f32.mrf.mxu1 }
 0x1b6   : > { %v5155_v58 = vpop.f32.mrf.mxu1 }
 0x1b7   : > { %v864_v54 = vadd.f32 %v863_v39, %v5155_v58  ;;  %v4029_v58 = vld [vmem:[%s6484_s4 + $0x120] sm:$0xff]  ;;  %v1536_v39 = vsub.s32 0, %v5421_v37 }
 0x1b8   : > { %v5157_v59 = vpop.f32.mrf.mxu1 }
 0x1b9   : > { %v868_v55 = vadd.f32 %v867_v40, %v5157_v59  ;;  %v4028_v59 = vld [vmem:[%s6484_s4 + $0x118] sm:$0xff]  ;;  %v1532_v40 = vld [vmem:[%s6483_s3] sm:$0x3] }
 0x1ba   : > { %v5159_v60 = vpop.f32.mrf.mxu1 }
 0x1bb   : > { %v870_v56 = vadd.f32 %v869_v41, %v5159_v60  ;;  %v4027_v60 = vld [vmem:[%s6484_s4 + $0x110] sm:$0xff]  ;;  %v1540_v41 = vsub.s32 1, %v5421_v37 }
 0x1bc   : > { %v4427_v61 = vpop.f32.mrf.mxu1 }
 0x1be   : > { %v955_v62 = vpop.f32.mrf.mxu1 }
 0x1bf   : > { %3966 = vmatmul.mubr.msk.f32.vlgmr.msra.gmra.mxu0 %vm563_vm0, %v955_v62 }
 0x1c0   : > { %v4430_v63 = vpop.f32.mrf.mxu1  ;;  %1065 = vmatprep.mubr.f32.mxu0 %v4799_v24  ;;  %4446 = vmatpush3.msra.mxu0 %v4964_v6  ;;  %v3991_v6 = vld [vmem:[%s6518_s23 + $0x88] sm:$0xff] }
 0x1c1   : > { %4447 = vmatprep.subr.mxu0 %v4966_v7 }
 0x1c2   : > { %v965_v0 = vpop.f32.mrf.mxu1  ;;  %4448 = vmatpush3.msra.mxu0 %v4966_v7  ;;  %v3992_v7 = vld [vmem:[%s6518_s23 + $0x90] sm:$0xff] }
 0x1c3   : > { %3967 = vmatmul.mubr.msk.f32.gmra.mxu0 %vm563_vm0, %v4427_v61  ;;  %4449 = vmatprep.subr.mxu0 %v4970_v8  ;;  %v862_v61 = vadd.f32 %v861_v38, %v5153_v57 }
 0x1c4   : > { %v4441_v1 = vpop.f32.mrf.mxu1  ;;  %1071 = vmatprep.mubr.f32.mxu0 %v4799_v24  ;;  %4450 = vmatpush3.msra.mxu0 %v4970_v8  ;;  %v3993_v8 = vld [vmem:[%s6518_s23 + $0x98] sm:$0xff] }
 0x1c5   : > { %4451 = vmatprep.subr.mxu0 %v4974_v9 }
 0x1c6   : > { %v1175_v2 = vpop.f32.mrf.mxu1  ;;  %4452 = vmatpush3.msra.mxu0 %v4974_v9  ;;  %v4005_v9 = vld [vmem:[%s6482_s2 + $0x138] sm:$0xff] }
 0x1c7   : > { %3968 = vmatmul.mubr.msk.f32.gmra.mxu0 %vm563_vm0, %v965_v0  ;;  %3986 = vmatmul.mubr.msk.f32.vlgmr.msra.gmra.mxu1 %vm563_vm0, %v1175_v2 }
 0x1c8   : > { %1077 = vmatprep.mubr.f32.mxu0 %v4799_v24  ;;  %1285 = vmatprep.mubr.f32.mxu1 %v4799_v24  ;;  %v4444_v3 = vpop.f32.mrf.mxu1 }
 0x1c9   : > { %1459 = vmatprep.subr.mxu0 %v4005_v9  ;;  %1595 = vmatpush1.msra.mxu1 %v1575_v17  ;;  %v4025_v9 = vld [vmem:[%s6484_s4 + $0x100] sm:$0xff]  ;;  %v4018_v17 = vld [vmem:[%s6484_s4 + $0xc8] sm:$0xff] }
 0x1ca   : > { %v1185_v5 = vpop.f32.mrf.mxu1  ;;  %1596 = vmatprep.subr.mxu1 %v4799_v24 }
 0x1cb   : > { %3969 = vmatmul.mubr.msk.f32.gmra.mxu0 %vm563_vm0, %v4430_v63  ;;  %3987 = vmatmul.mubr.msk.f32.gmra.mxu1 %vm563_vm0, %v4441_v1 }
 0x1cc   : > { %1291 = vmatprep.mubr.f32.mxu1 %v4799_v24  ;;  %4453 = vmatprep.mubr.msk.f32.mxu0 %vm563_vm0, %v3990_v4 }
 0x1cd   : > { %1597 = vmatpush1.msra.mxu1 %v1574_v18  ;;  %v4017_v18 = vld [vmem:[%s6484_s4 + $0xc0] sm:$0xff] }
 0x1ce   : > { %1598 = vmatprep.subr.mxu1 %v4799_v24 }
 0x1cf   : > { %3988 = vmatmul.mubr.msk.f32.gmra.mxu1 %vm563_vm0, %v1185_v5  ;;  %4454 = vmatmul.mubr.msk.f32.vlgmr.msra.gmra.mxu0 %vm563_vm0, %v3991_v6 }
 0x1d0   : > { %1297 = vmatprep.mubr.f32.mxu1 %v4799_v24  ;;  %4456 = vmatprep.mubr.msk.f32.mxu0 %vm563_vm0, %v3992_v7 }
 0x1d1   : > { %1460 = vmatpush1.msra.mxu0 %v4004_v10  ;;  %1599 = vmatpush1.msra.mxu1 %v1573_v19  ;;  %v4016_v19 = vld [vmem:[%s6484_s4 + $0xb8] sm:$0xff] }
 0x1d2   : > { %1461 = vmatprep.subr.mxu0 %v4003_v11  ;;  %1600 = vmatprep.subr.mxu1 %v4799_v24  ;;  %v4024_v11 = vld [vmem:[%s6484_s4 + $0xf8] sm:$0xff] }
 0x1d3   : > { %3989 = vmatmul.mubr.msk.f32.gmra.mxu1 %vm563_vm0, %v4444_v3  ;;  %4457 = vmatmul.mubr.msk.f32.gmra.mxu0 %vm563_vm0, %v3993_v8  ;;  %v4026_v8 = vld [vmem:[%s6484_s4 + $0x108] sm:$0xff] }
 0x1d4   : > { %1499 = vmatprep.mubr.f32.mxu0 %v4799_v24  ;;  %1462 = vmatpush1.msra.mxu0 %v4002_v12  ;;  %v4023_v12 = vld [vmem:[%s6484_s4 + $0xf0] sm:$0xff] }
 0x1d5   : > { %1463 = vmatprep.subr.mxu0 %v4001_v13  ;;  %1601 = vmatpush1.msra.mxu1 %v1572_v20  ;;  %v4022_v13 = vld [vmem:[%s6484_s4 + $0xe8] sm:$0xff]  ;;  %v4015_v20 = vld [vmem:[%s6484_s4 + $0xb0] sm:$0xff] }
 0x1d6   : > { %1464 = vmatpush1.msra.mxu0 %v4000_v14  ;;  %1602 = vmatprep.subr.mxu1 %v4799_v24  ;;  %v4021_v14 = vld [vmem:[%s6484_s4 + $0xe0] sm:$0xff] }
 0x1d7   : > { %1465 = vmatprep.subr.mxu0 %v3999_v15  ;;  %1603 = vmatpush1.msra.mxu1 %v1571_v21  ;;  %v4020_v15 = vld [vmem:[%s6484_s4 + $0xd8] sm:$0xff]  ;;  %v4014_v21 = vld [vmem:[%s6484_s4 + $0xa8] sm:$0xff] }
 0x1d8   : > { %1466 = vmatpush1.msra.mxu0 %v3998_v16  ;;  %1604 = vmatprep.subr.mxu1 %v4799_v24  ;;  %v4019_v16 = vld [vmem:[%s6484_s4 + $0xd0] sm:$0xff] }
 0x1d9   : > { %1701 = vmatprep.subr.mxu0 %v4799_v24  ;;  %1605 = vmatpush1.msra.mxu1 %v1570_v22  ;;  %v1580_v22 = vld [vmem:[%s6484_s4 + $0xa0] sm:$0xff] }
 0x1da   : > { %1606 = vmatprep.subr.mxu1 %v4799_v24 }
 0x1db   : > { %1607 = vmatpush1.msra.mxu1 %v1569_v23  ;;  %v4034_v23 = vld [vmem:[%s6484_s4 + $0x148] sm:$0xff] }
 0x1dc   : > { %1608 = vmatprep.subr.mxu1 %v4799_v24 }
 0x1dd   : > { %1609 = vmatpush1.msra.mxu1 %v1568_v25  ;;  %v1579_v25 = vld [vmem:[%s6484_s4 + $0x98] sm:$0xff] }
 0x1de   : > { %1610 = vmatprep.subr.mxu1 %v4799_v24 }
 0x1df   : > { %1611 = vmatpush1.msra.mxu1 %v1567_v26  ;;  %v4033_v26 = vld [vmem:[%s6484_s4 + $0x140] sm:$0xff] }
 0x1e0   : > { %1612 = vmatprep.subr.mxu1 %v4799_v24 }
 0x1e1   : > { %1613 = vmatpush1.msra.mxu1 %v1566_v27  ;;  %v1578_v27 = vld [vmem:[%s6484_s4 + $0x90] sm:$0xff] }
 0x1e2   : > { %1614 = vmatprep.subr.mxu1 %v4799_v24 }
 0x1e3   : > { %1615 = vmatpush1.msra.mxu1 %v1565_v28  ;;  %v4032_v28 = vld [vmem:[%s6484_s4 + $0x138] sm:$0xff] }
 0x1e4   : > { %1616 = vmatprep.subr.mxu1 %v4799_v24 }
 0x1e5   : > { %1617 = vmatpush1.msra.mxu1 %v1564_v29  ;;  %v1577_v29 = vld [vmem:[%s6484_s4 + $0x88] sm:$0xff] }
 0x1e6   : > { %1618 = vmatprep.subr.mxu1 %v4799_v24 }
 0x1e7   : > { %1619 = vmatpush1.msra.mxu1 %v1563_v30  ;;  %v4031_v30 = vld [vmem:[%s6484_s4 + $0x130] sm:$0xff] }
 0x1e8   : > { %1620 = vmatprep.subr.mxu1 %v4799_v24 }
 0x1e9   : > { %1621 = vmatpush1.msra.mxu1 %v1562_v31  ;;  %v1576_v31 = vld [vmem:[%s6484_s4 + $0x80] sm:$0xff] }
 0x1ea   : > { %1622 = vmatprep.subr.mxu1 %v4799_v24 }
 0x1eb   : > { %1623 = vmatpush1.msra.mxu1 %v1561_v32  ;;  %v4030_v32 = vld [vmem:[%s6484_s4 + $0x128] sm:$0xff] }
 0x1ec   : > { %1624 = vmatprep.subr.mxu1 %v4799_v24 }
 0x1ed   : > { %1625 = vmatpush1.msra.mxu1 %v1560_v33 }
 0x1ee   : > { %1648 = vmatprep.subr.mxu1 %v4799_v24 }
 0x1ef   : > { %1649 = vmatpush2.msra.mxu1 %v1580_v22 }
 0x1f0   : > { %1650 = vmatprep.subr.mxu1 %v4799_v24 }
 0x1f1   : > { %1651 = vmatpush2.msra.mxu1 %v1579_v25  ;;  %v1790_v25 = vld [vmem:[%s6485_s5] sm:$0xff] }
 0x1f2   : > { %1652 = vmatprep.subr.mxu1 %v4799_v24 }
 0x1f3   : > { %1653 = vmatpush2.msra.mxu1 %v1578_v27  ;;  %v4070_v27 = vld [vmem:[%s6487_s7 + $0x150] sm:$0xf] }
 0x1f4   : > { %1654 = vmatprep.subr.mxu1 %v4799_v24 }
 0x1f5   : > { %1655 = vmatpush2.msra.mxu1 %v1577_v29  ;;  %v4068_v29 = vld [vmem:[%s6487_s7 + $0x140] sm:$0xff] }
 0x1f6   : > { %1656 = vmatprep.subr.mxu1 %v4799_v24 }
 0x1f7   : > { %1657 = vmatpush2.msra.mxu1 %v1576_v31  ;;  %v4066_v31 = vld [vmem:[%s6487_s7 + $0x130] sm:$0xff] }
 0x27f   : > { %v1061_v43 = vpop.f32.mrf.mxu0 }
 0x280   : > { %v5290_v45 = vadd.f32 %v1061_v43, %v850_v42 }
 0x281   : > { %v1063_v46 = vpop.f32.mrf.mxu0 }
 0x282   : > { %v5293_v48 = vadd.f32 %v1063_v46, %v852_v44  ;;  %v1537_v46 = vrot.slane %v1532_v40, %v1536_v39 }
 0x283   : > { %v1067_v49 = vpop.f32.mrf.mxu0 }
 0x284   : > { %v5296_v51 = vadd.f32 %v1067_v49, %v856_v47 }
 0x285   : > { %v1069_v52 = vpop.f32.mrf.mxu0 }
 0x286   : > { %v5299_v62 = vadd.f32 %v1069_v52, %v858_v50  ;;  %v1541_v50 = vrot.slane %v1532_v40, %v1540_v41  ;;  %v4059_v40 = vld [vmem:[%s6487_s7 + $0xf8] sm:$0xff] }
 0x287   : > { %v1073_v53 = vpop.f32.mrf.mxu0  ;;  %v1281_v33 = vpop.f32.mrf.mxu1 }
 0x288   : > { %v5302_v63 = vadd.f32 %v1073_v53, %v862_v61  ;;  %v1304_v43 = vadd.f32 %v1281_v33, %v5290_v45  ;;  %v4064_v33 = vld [vmem:[%s6487_s7 + $0x120] sm:$0xff] }
 0x289   : > { %v1075_v0 = vpop.f32.mrf.mxu0  ;;  %v1283_v34 = vpop.f32.mrf.mxu1 }
 0x28a   : > { %v5305_v1 = vadd.f32 %v1075_v0, %v864_v54  ;;  %v1305_v47 = vadd.f32 %v1283_v34, %v5293_v48  ;;  %v4063_v34 = vld [vmem:[%s6487_s7 + $0x118] sm:$0xff] }
 0x28b   : > { %v1079_v2 = vpop.f32.mrf.mxu0  ;;  %v1287_v36 = vpop.f32.mrf.mxu1 }
 0x28c   : > { %v5308_v3 = vadd.f32 %v1079_v2, %v868_v55  ;;  %v1306_v53 = vadd.f32 %v1287_v36, %v5296_v51  ;;  %v4061_v36 = vld [vmem:[%s6487_s7 + $0x108] sm:$0xff] }
 0x28d   : > { %v1081_v4 = vpop.f32.mrf.mxu0  ;;  %v1289_v38 = vpop.f32.mrf.mxu1 }
 0x28e   : > { %v5310_v5 = vadd.f32 %v1081_v4, %v870_v56  ;;  %v1307_v2 = vadd.f32 %v1289_v38, %v5299_v62  ;;  %v4060_v38 = vld [vmem:[%s6487_s7 + $0x100] sm:$0xff] }
 0x28f   : > { %v4455_v57 = vpop.f32.mrf.mxu0  ;;  %v1293_v42 = vpop.f32.mrf.mxu1 }
 0x290   : > { %v1308_v48 = vadd.f32 %v1293_v42, %v5302_v63 }
 0x291   : > { %v1395_v6 = vpop.f32.mrf.mxu0  ;;  %v1295_v52 = vpop.f32.mrf.mxu1 }
 0x292   : > { %4006 = vmatmul.mubr.msk.f32.vlgmr.msra.gmra.mxu0 %vm563_vm0, %v1395_v6 }
 0x293   : > { %1505 = vmatprep.mubr.f32.mxu0 %v4799_v24  ;;  %1702 = vmatpush1.msra.mxu0 %v4029_v58  ;;  %v4458_v7 = vpop.f32.mrf.mxu0  ;;  %v1299_v4 = vpop.f32.mrf.mxu1 }
 0x294   : > { %1703 = vmatprep.subr.mxu0 %v4799_v24 }
 0x295   : > { %1704 = vmatpush1.msra.mxu0 %v4028_v59  ;;  %v1405_v10 = vpop.f32.mrf.mxu0  ;;  %v1301_v62 = vpop.f32.mrf.mxu1 }
 0x296   : > { %4007 = vmatmul.mubr.msk.f32.gmra.mxu0 %vm563_vm0, %v4455_v57  ;;  %1705 = vmatprep.subr.mxu0 %v4799_v24 }
 0x297   : > { %1511 = vmatprep.mubr.f32.mxu0 %v4799_v24  ;;  %1706 = vmatpush1.msra.mxu0 %v4027_v60 }
 0x298   : > { %1707 = vmatprep.subr.mxu0 %v4799_v24 }
 0x299   : > { %1708 = vmatpush1.msra.mxu0 %v4026_v8  ;;  %v1309_v8 = vadd.f32 %v1295_v52, %v5305_v1 }
 0x29a   : > { %4008 = vmatmul.mubr.msk.f32.gmra.mxu0 %vm563_vm0, %v1405_v10  ;;  %1709 = vmatprep.subr.mxu0 %v4799_v24 }
 0x29b   : > { %1517 = vmatprep.mubr.f32.mxu0 %v4799_v24  ;;  %1710 = vmatpush1.msra.mxu0 %v4025_v9 }
 0x29c   : > { %1711 = vmatprep.subr.mxu0 %v4799_v24 }
 0x29d   : > { %1712 = vmatpush1.msra.mxu0 %v4024_v11  ;;  %v1310_v11 = vadd.f32 %v1299_v4, %v5308_v3 }
 0x29e   : > { %4009 = vmatmul.mubr.msk.f32.gmra.mxu0 %vm563_vm0, %v4458_v7  ;;  %1713 = vmatprep.subr.mxu0 %v4799_v24 }
 0x29f   : > { %1714 = vmatpush1.msra.mxu0 %v4023_v12 }
 0x2a0   : > { %1715 = vmatprep.subr.mxu0 %v4799_v24 }
 0x2a1   : > { %1716 = vmatpush1.msra.mxu0 %v4022_v13 }
 0x2a2   : > { %1717 = vmatprep.subr.mxu0 %v4799_v24 }
 0x2a3   : > { %1718 = vmatpush1.msra.mxu0 %v4021_v14 }
 0x2a4   : > { %1719 = vmatprep.subr.mxu0 %v4799_v24 }
 0x2a5   : > { %1720 = vmatpush1.msra.mxu0 %v4020_v15 }
 0x2a6   : > { %1721 = vmatprep.subr.mxu0 %v4799_v24 }
 0x2a7   : > { %1722 = vmatpush1.msra.mxu0 %v4019_v16  ;;  %v1311_v16 = vadd.f32 %v1301_v62, %v5310_v5  ;;  %v4054_v62 = vld [vmem:[%s6487_s7 + $0xd0] sm:$0xff] }
 0x2a8   : > { %1723 = vmatprep.subr.mxu0 %v4799_v24 }
 0x2a9   : > { %1724 = vmatpush1.msra.mxu0 %v4018_v17 }
 0x2aa   : > { %1725 = vmatprep.subr.mxu0 %v4799_v24 }
 0x2ab   : > { %1726 = vmatpush1.msra.mxu0 %v4017_v18 }
 0x2ac   : > { %1727 = vmatprep.subr.mxu0 %v4799_v24 }
 0x2ad   : > { %1728 = vmatpush1.msra.mxu0 %v4016_v19 }
 0x2ae   : > { %1729 = vmatprep.subr.mxu0 %v4799_v24 }
 0x2af   : > { %1730 = vmatpush1.msra.mxu0 %v4015_v20 }
 0x2b0   : > { %1731 = vmatprep.subr.mxu0 %v4799_v24 }
 0x2b1   : > { %1732 = vmatpush1.msra.mxu0 %v4014_v21 }
 0x2b2   : > { %1755 = vmatprep.subr.mxu0 %v4799_v24 }
 0x2b3   : > { %1756 = vmatpush2.msra.mxu0 %v4034_v23 }
 0x2b4   : > { %1757 = vmatprep.subr.mxu0 %v4799_v24 }
 0x2b5   : > { %1758 = vmatpush2.msra.mxu0 %v4033_v26  ;;  %v4071_v26 = vld [vmem:[%s6487_s7 + $0x158] sm:$0xf] }
 0x2b6   : > { %1759 = vmatprep.subr.mxu0 %v4799_v24 }
 0x2b7   : > { %1760 = vmatpush2.msra.mxu0 %v4032_v28  ;;  %v4069_v28 = vld [vmem:[%s6487_s7 + $0x148] sm:$0xff] }
 0x2b8   : > { %1761 = vmatprep.subr.mxu0 %v4799_v24 }
 0x2b9   : > { %1762 = vmatpush2.msra.mxu0 %v4031_v30  ;;  %v4067_v30 = vld [vmem:[%s6487_s7 + $0x138] sm:$0xff] }
 0x2ba   : > { %1763 = vmatprep.subr.mxu0 %v4799_v24 }
 0x2bb   : > { %1764 = vmatpush2.msra.mxu0 %v4030_v32  ;;  %v4065_v32 = vld [vmem:[%s6487_s7 + $0x128] sm:$0xff] }
 0x2bc   : > { %4072 = vmatprep.subr.msk.mxu0 %vm2100_vm2, %v4071_v26  ;;  %v1973_v26 = vld [vmem:[%s6487_s7 + $0x70] sm:$0xff] }
 0x352   : > { %v1501_v44 = vpop.f32.mrf.mxu0 }
 0x353   : > { %v1524_v49 = vadd.f32 %v1501_v44, %v1304_v43 }
 0x354   : > { %v1503_v61 = vpop.f32.mrf.mxu0 }
 0x355   : > { %v1525_v54 = vadd.f32 %v1503_v61, %v1305_v47  ;;  %v1544_v0 = vadd.f32 %v1537_v46, %v1524_v49 }
 0x356   : > { %v1507_v55 = vpop.f32.mrf.mxu0 }
 0x357   : > { %v1545_v45 = vadd.f32 %v1541_v50, %v1525_v54  ;;  %v1526_v56 = vadd.f32 %v1507_v55, %v1306_v53  ;;  %v1552_v59 = vmax.f32 %v1544_v0, 0.0 }
 0x358   : > { %v1509_v57 = vpop.f32.mrf.mxu0 }
 0x359   : > { %v1553_v58 = vmax.f32 %v1545_v45, 0.0  ;;  %v1527_v6 = vadd.f32 %v1509_v57, %v1307_v2  ;;  %v1546_v60 = vadd.f32 %v1537_v46, %v1526_v56 }
 0x35a   : > { %v1513_v7 = vpop.f32.mrf.mxu0 }
 0x35b   : > { %v1547_v51 = vadd.f32 %v1541_v50, %v1527_v6  ;;  %v1528_v9 = vadd.f32 %v1513_v7, %v1308_v48  ;;  %4010 = vmatprep.mubr.msk.f32.mxu1 %vm1581_vm1, %v1553_v58  ;;  %4035 = vmatprep.mubr.msk.f32.mxu0 %vm1581_vm1, %v1553_v58  ;;  %v1554_v13 = vmax.f32 %v1546_v60, 0.0  ;;  %v1791_v6 = vld [vmem:[%s6485_s5 + $0x8] sm:$0x3f]  ;;  %v4042_v60 = vld [vmem:[%s6485_s5 + $0x18] sm:$0x3f]  ;;  %v4058_v7 = vld [vmem:[%s6487_s7 + $0xf0] sm:$0xff] }
 0x35c   : > { %v1515_v10 = vpop.f32.mrf.mxu0  ;;  %1659 = vmatmul.mubr.f32.vlgmr.msra.gmra.mxu1 %v1552_v59  ;;  %1766 = vmatmul.mubr.f32.vlgmr.msra.gmra.mxu0 %v1552_v59  ;;  %v4041_v59 = vld [vmem:[%s6485_s5 + $0x10] sm:$0xff] }
 0x35d   : > { %v1555_v63 = vmax.f32 %v1547_v51, 0.0  ;;  %v1529_v12 = vadd.f32 %v1515_v10, %v1309_v8  ;;  %v1548_v14 = vadd.f32 %v1537_v46, %v1528_v9  ;;  %4073 = vmatpush1.msk.msra.mxu0 %vm2100_vm2, %v4070_v27  ;;  %v4057_v8 = vld [vmem:[%s6487_s7 + $0xe8] sm:$0xff]  ;;  %v4056_v51 = vld [vmem:[%s6487_s7 + $0xe0] sm:$0xff]  ;;  %v4055_v9 = vld [vmem:[%s6487_s7 + $0xd8] sm:$0xff] }
 0x35e   : > { %v1519_v15 = vpop.f32.mrf.mxu0  ;;  %2119 = vmatprep.subr.mxu0 %v4069_v28  ;;  %v4053_v10 = vld [vmem:[%s6487_s7 + $0xc8] sm:$0xff]  ;;  %v1971_v28 = vld [vmem:[%s6487_s7 + $0x60] sm:$0xff] }
 0x35f   : > { %v1549_v1 = vadd.f32 %v1541_v50, %v1529_v12  ;;  %v1530_v17 = vadd.f32 %v1519_v15, %v1310_v11  ;;  %4011 = vmatprep.mubr.msk.f32.mxu1 %vm1581_vm1, %v1555_v63  ;;  %4036 = vmatprep.mubr.msk.f32.mxu0 %vm1581_vm1, %v1555_v63  ;;  %v1556_v21 = vmax.f32 %v1548_v14, 0.0  ;;  %v4052_v11 = vld [vmem:[%s6487_s7 + $0xc0] sm:$0xff]  ;;  %v4051_v63 = vld [vmem:[%s6487_s7 + $0xb8] sm:$0xff]  ;;  %v4050_v12 = vld [vmem:[%s6487_s7 + $0xb0] sm:$0xff] }
 0x360   : > { %v1521_v18 = vpop.f32.mrf.mxu0  ;;  %1664 = vmatmul.mubr.f32.gmra.mxu1 %v1554_v13  ;;  %1771 = vmatmul.mubr.f32.gmra.mxu0 %v1554_v13  ;;  %v4045_v13 = vld [vmem:[%s6486_s6 + $0x10] sm:$0xff]  ;;  %v1972_v27 = vld [vmem:[%s6487_s7 + $0x68] sm:$0xff] }
 0x361   : > { %v1557_v19 = vmax.f32 %v1549_v1, 0.0  ;;  %v1531_v20 = vadd.f32 %v1521_v18, %v1311_v16  ;;  %v1550_v3 = vadd.f32 %v1537_v46, %v1530_v17  ;;  %2120 = vmatpush1.msra.mxu0 %v4068_v29  ;;  %v1970_v29 = vld [vmem:[%s6487_s7 + $0x58] sm:$0xff] }
 0x362   : > { %2121 = vmatprep.subr.mxu0 %v4067_v30  ;;  %v1969_v30 = vld [vmem:[%s6487_s7 + $0x50] sm:$0xff] }
 0x363   : > { %v1551_v22 = vadd.f32 %v1541_v50, %v1531_v20  ;;  %4012 = vmatprep.mubr.msk.f32.mxu1 %vm1581_vm1, %v1557_v19  ;;  %4037 = vmatprep.mubr.msk.f32.mxu0 %vm1581_vm1, %v1557_v19  ;;  %v1558_v23 = vmax.f32 %v1550_v3, 0.0  ;;  %v4046_v19 = vld [vmem:[%s6486_s6 + $0x18] sm:$0x3f]  ;;  %v1980_v20 = vld [vmem:[%s6487_s7 + $0xa8] sm:$0xf] }
 0x364   : > { %1669 = vmatmul.mubr.f32.gmra.mxu1 %v1556_v21  ;;  %1776 = vmatmul.mubr.f32.gmra.mxu0 %v1556_v21  ;;  %v1979_v21 = vld [vmem:[%s6487_s7 + $0xa0] sm:$0xf]  ;;  %v1978_v3 = vld [vmem:[%s6487_s7 + $0x98] sm:$0xff] }
 0x365   : > { %v1559_v5 = vmax.f32 %v1551_v22, 0.0  ;;  %2122 = vmatpush1.msra.mxu0 %v4066_v31  ;;  %v1977_v22 = vld [vmem:[%s6487_s7 + $0x90] sm:$0xff]  ;;  %v1968_v31 = vld [vmem:[%s6487_s7 + $0x48] sm:$0xff] }
 0x366   : > { %2123 = vmatprep.subr.mxu0 %v4065_v32  ;;  %v1967_v32 = vld [vmem:[%s6487_s7 + $0x40] sm:$0xff] }
 0x367   : > { %4013 = vmatprep.mubr.msk.f32.mxu1 %vm1581_vm1, %v1559_v5  ;;  %4038 = vmatprep.mubr.msk.f32.mxu0 %vm1581_vm1, %v1559_v5  ;;  %v1976_v5 = vld [vmem:[%s6487_s7 + $0x88] sm:$0xff] }
 0x368   : > { %1674 = vmatmul.mubr.f32.gmra.mxu1 %v1558_v23  ;;  %1781 = vmatmul.mubr.f32.gmra.mxu0 %v1558_v23  ;;  %v1975_v23 = vld [vmem:[%s6487_s7 + $0x80] sm:$0xff] }
 0x369   : > { %2171 = vmatprep.mubr.f32.mxu0 %v4799_v24  ;;  %4467 = vmatprep.mubr.msk.f32.mxu1 %vm563_vm0, %v1790_v25  ;;  %v1974_v25 = vld [vmem:[%s6487_s7 + $0x78] sm:$0xff] }
 0x36a   : > { %2124 = vmatpush1.msra.mxu0 %v4064_v33  ;;  %v1966_v33 = vld [vmem:[%s6487_s7 + $0x38] sm:$0xff] }
 0x36b   : > { %2125 = vmatprep.subr.mxu0 %v4063_v34  ;;  %v1965_v34 = vld [vmem:[%s6487_s7 + $0x30] sm:$0xff] }
 0x36c   : > { %2126 = vmatpush1.msra.mxu0 %v4062_v35  ;;  %v1964_v35 = vld [vmem:[%s6487_s7 + $0x28] sm:$0xff] }
 0x36d   : > { %2127 = vmatprep.subr.mxu0 %v4061_v36  ;;  %v1963_v36 = vld [vmem:[%s6487_s7 + $0x20] sm:$0xff] }
 0x36e   : > { %2128 = vmatpush1.msra.mxu0 %v4060_v38  ;;  %v1962_v38 = vld [vmem:[%s6487_s7 + $0x18] sm:$0xff] }
 0x36f   : > { %2129 = vmatprep.subr.mxu0 %v4059_v40  ;;  %v1961_v40 = vld [vmem:[%s6487_s7 + $0x10] sm:$0xff] }
 0x370   : > { %2130 = vmatpush1.msra.mxu0 %v4058_v7  ;;  %v4089_v7 = vld [vmem:[%s6487_s7 + $0x180] sm:$0xff] }
 0x371   : > { %2131 = vmatprep.subr.mxu0 %v4057_v8  ;;  %v4088_v8 = vld [vmem:[%s6487_s7 + $0x178] sm:$0xff] }
 0x372   : > { %2132 = vmatpush1.msra.mxu0 %v4056_v51  ;;  %v4087_v51 = vld [vmem:[%s6487_s7 + $0x170] sm:$0xff] }
 0x373   : > { %2133 = vmatprep.subr.mxu0 %v4055_v9  ;;  %v4086_v9 = vld [vmem:[%s6487_s7 + $0x168] sm:$0xff] }
 0x374   : > { %2134 = vmatpush1.msra.mxu0 %v4054_v62  ;;  %v4085_v62 = vld [vmem:[%s6487_s7 + $0x160] sm:$0xff] }
 0x375   : > { %2135 = vmatprep.subr.mxu0 %v4053_v10  ;;  %v4137_v10 = vld [vmem:[%s6487_s7 + $0x2b8] sm:$0xf] }
 0x376   : > { %2136 = vmatpush1.msra.mxu0 %v4052_v11  ;;  %v4136_v11 = vld [vmem:[%s6487_s7 + $0x2b0] sm:$0xf] }
 0x377   : > { %2137 = vmatprep.subr.mxu0 %v4051_v63  ;;  %v4135_v63 = vld [vmem:[%s6487_s7 + $0x2a8] sm:$0xff] }
 0x378   : > { %2138 = vmatpush1.msra.mxu0 %v4050_v12  ;;  %v4134_v12 = vld [vmem:[%s6487_s7 + $0x2a0] sm:$0xff] }
 0x41c   : > { %v1660_v42 = vpop.f32.mrf.mxu1  ;;  %v1767_v43 = vpop.f32.mrf.mxu0 }
 0x41d   : > { %v1786_v58 = vmax.f32 %v1660_v42, %v1767_v43  ;;  %v1960_v42 = vld [vmem:[%s6487_s7 + $0x8] sm:$0xff]  ;;  %v1959_v43 = vld [vmem:[%s6487_s7] sm:$0xff] }
 0x41e   : > { %v1662_v44 = vpop.f32.mrf.mxu1  ;;  %v1769_v46 = vpop.f32.mrf.mxu0 }
 0x420   : > { %v1665_v47 = vpop.f32.mrf.mxu1  ;;  %v1772_v49 = vpop.f32.mrf.mxu0 }
 0x421   : > { %v1787_v48 = vmax.f32 %v1665_v47, %v1772_v49  ;;  %v4106_v47 = vld [vmem:[%s6487_s7 + $0x208] sm:$0xf]  ;;  %v4080_v49 = vld [vmem:[%s6486_s6 + $0x20] sm:$0xff] }
 0x422   : > { %v1667_v50 = vpop.f32.mrf.mxu1  ;;  %v1774_v52 = vpop.f32.mrf.mxu0 }
 0x423   : > { %v4081_v50 = vld [vmem:[%s6486_s6 + $0x28] sm:$0x3f]  ;;  %v4105_v52 = vld [vmem:[%s6487_s7 + $0x200] sm:$0xf] }
 0x424   : > { %v1670_v61 = vpop.f32.mrf.mxu1  ;;  %v1777_v53 = vpop.f32.mrf.mxu0 }
 0x425   : > { %v1788_v57 = vmax.f32 %v1670_v61, %v1777_v53  ;;  %v4104_v61 = vld [vmem:[%s6487_s7 + $0x1f8] sm:$0xff]  ;;  %v4103_v53 = vld [vmem:[%s6487_s7 + $0x1f0] sm:$0xff] }
 0x426   : > { %v1672_v54 = vpop.f32.mrf.mxu1  ;;  %v1779_v0 = vpop.f32.mrf.mxu0 }
 0x427   : > { %v4102_v54 = vld [vmem:[%s6487_s7 + $0x1e8] sm:$0xff]  ;;  %v4101_v0 = vld [vmem:[%s6487_s7 + $0x1e0] sm:$0xff] }
 0x428   : > { %v1675_v55 = vpop.f32.mrf.mxu1  ;;  %v1782_v2 = vpop.f32.mrf.mxu0 }
 0x429   : > { %v1789_v45 = vmax.f32 %v1675_v55, %v1782_v2  ;;  %v4100_v55 = vld [vmem:[%s6487_s7 + $0x1d8] sm:$0xff]  ;;  %v4099_v2 = vld [vmem:[%s6487_s7 + $0x1d0] sm:$0xff] }
 0x42a   : > { %v1677_v56 = vpop.f32.mrf.mxu1  ;;  %v1784_v4 = vpop.f32.mrf.mxu0 }
 0x42b   : > { %4459 = vmatprep.subr.mxu1 %v1789_v45  ;;  %v4097_v56 = vld [vmem:[%s6487_s7 + $0x1c0] sm:$0xff]  ;;  %v4096_v4 = vld [vmem:[%s6487_s7 + $0x1b8] sm:$0xff] }
 0x42c   : > { %4460 = vmatpush3.msra.mxu1 %v1789_v45 }
 0x42d   : > { %4461 = vmatprep.subr.mxu1 %v1788_v57 }
 0x42e   : > { %4462 = vmatpush3.msra.mxu1 %v1788_v57 }
 0x42f   : > { %4463 = vmatprep.subr.mxu1 %v1787_v48 }
 0x430   : > { %4464 = vmatpush3.msra.mxu1 %v1787_v48 }
 0x431   : > { %4465 = vmatprep.subr.mxu1 %v1786_v58 }
 0x432   : > { %4466 = vmatpush3.msra.mxu1 %v1786_v58 }
 0x433   : > { %4470 = vmatprep.subr.mxu1 %v1789_v45  ;;  %4468 = vmatmul.mubr.msk.f32.vlgmr.msra.gmra.mxu1 %vm563_vm0, %v1791_v6  ;;  %v4092_v6 = vld [vmem:[%s6487_s7 + $0x198] sm:$0xff] }
 0x434   : > { %4471 = vmatpush3.msra.mxu1 %v1789_v45  ;;  %4478 = vmatprep.mubr.msk.f32.mxu1 %vm563_vm0, %v4041_v59  ;;  %v4098_v45 = vld [vmem:[%s6487_s7 + $0x1c8] sm:$0xff]  ;;  %v4091_v59 = vld [vmem:[%s6487_s7 + $0x190] sm:$0xff] }
 0x435   : > { %4472 = vmatprep.subr.mxu1 %v1788_v57 }
 0x436   : > { %4473 = vmatpush3.msra.mxu1 %v1788_v57  ;;  %v4095_v57 = vld [vmem:[%s6487_s7 + $0x1b0] sm:$0xff] }
 0x437   : > { %4474 = vmatprep.subr.mxu1 %v1787_v48 }
 0x438   : > { %4475 = vmatpush3.msra.mxu1 %v1787_v48  ;;  %v4094_v48 = vld [vmem:[%s6487_s7 + $0x1a8] sm:$0xff] }
 0x439   : > { %4476 = vmatprep.subr.mxu1 %v1786_v58 }
 0x43a   : > { %4477 = vmatpush3.msra.mxu1 %v1786_v58  ;;  %v4093_v58 = vld [vmem:[%s6487_s7 + $0x1a0] sm:$0xff] }
 0x43b   : > { %4479 = vmatmul.mubr.msk.f32.vlgmr.msra.gmra.mxu1 %vm563_vm0, %v4042_v60  ;;  %v4090_v60 = vld [vmem:[%s6487_s7 + $0x188] sm:$0xff] }
 0x43c   : > { %4485 = vmatprep.mubr.msk.f32.mxu1 %vm1984_vm3, %v4045_v13  ;;  %v4133_v13 = vld [vmem:[%s6487_s7 + $0x298] sm:$0xff] }
 0x4f3   : > { %v4469_v14 = vpop.f32.mrf.mxu1 }
 0x4f5   : > { %v1864_v15 = vpop.f32.mrf.mxu1 }
 0x4fb   : > { %v4480_v16 = vpop.f32.mrf.mxu1 }
 0x4fc   : > { %v5537_v1 = vmax.f32 %v4469_v14, %v4480_v16  ;;  %v4132_v14 = vld [vmem:[%s6487_s7 + $0x290] sm:$0xff]  ;;  %v4130_v16 = vld [vmem:[%s6487_s7 + $0x280] sm:$0xff] }
 0x4fd   : > { %v1948_v17 = vpop.f32.mrf.mxu1 }
 0x4fe   : > { %v5539_v18 = vmax.f32 %v1864_v15, %v1948_v17  ;;  %4481 = vmatprep.subr.msk.mxu1 %vm1991_vm4, %v5537_v1  ;;  %4488 = vmatprep.subr.msk.mxu0 %vm1991_vm4, %v5537_v1  ;;  %v4131_v15 = vld [vmem:[%s6487_s7 + $0x288] sm:$0xff]  ;;  %v4129_v17 = vld [vmem:[%s6487_s7 + $0x278] sm:$0xff] }
 0x4ff   : > { %4482 = vmatpush3.msk.msra.mxu1 %vm1991_vm4, %v5537_v1 }
 0x500   : > { %4483 = vmatprep.subr.mxu1 %v5539_v18 }
 0x501   : > { %4484 = vmatpush3.msra.mxu1 %v5539_v18 }
 0x502   : > { %4486 = vmatmul.mubr.msk.f32.vlgmr.msra.gmra.mxu1 %vm1984_vm3, %v4046_v19  ;;  %4076 = vmatprep.subr.msk.mxu1 %vm2100_vm2, %v1980_v20  ;;  %v4128_v19 = vld [vmem:[%s6487_s7 + $0x270] sm:$0xff]  ;;  %v4127_v20 = vld [vmem:[%s6487_s7 + $0x268] sm:$0xff] }
 0x503   : > { %4077 = vmatpush1.msk.msra.mxu1 %vm2100_vm2, %v1979_v21  ;;  %2259 = vmatprep.mubr.f32.mxu1 %v4799_v24 }
 0x504   : > { %2207 = vmatprep.subr.mxu1 %v1978_v3 }
 0x505   : > { %2208 = vmatpush1.msra.mxu1 %v1977_v22 }
 0x506   : > { %2209 = vmatprep.subr.mxu1 %v1976_v5 }
 0x507   : > { %2210 = vmatpush1.msra.mxu1 %v1975_v23 }
 0x508   : > { %2211 = vmatprep.subr.mxu1 %v1974_v25 }
 0x509   : > { %2212 = vmatpush1.msra.mxu1 %v1973_v26  ;;  %v4111_v26 = vld [vmem:[%s6486_s6 + $0x30] sm:$0xff] }
 0x50a   : > { %2213 = vmatprep.subr.mxu1 %v1972_v27  ;;  %v4112_v27 = vld [vmem:[%s6486_s6 + $0x38] sm:$0x3f] }
 0x50b   : > { %2214 = vmatpush1.msra.mxu1 %v1971_v28  ;;  %v4142_v28 = vld [vmem:[%s6486_s6 + $0x40] sm:$0xff] }
 0x50c   : > { %2215 = vmatprep.subr.mxu1 %v1970_v29  ;;  %v4143_v29 = vld [vmem:[%s6486_s6 + $0x48] sm:$0x3f] }
 0x50d   : > { %2216 = vmatpush1.msra.mxu1 %v1969_v30  ;;  %v4168_v30 = vld [vmem:[%s6487_s7 + $0x368] sm:$0xf] }
 0x50e   : > { %2217 = vmatprep.subr.mxu1 %v1968_v31  ;;  %v4167_v31 = vld [vmem:[%s6487_s7 + $0x360] sm:$0xf] }
 0x50f   : > { %2218 = vmatpush1.msra.mxu1 %v1967_v32  ;;  %v4165_v32 = vld [vmem:[%s6487_s7 + $0x350] sm:$0xff] }
 0x510   : > { %2219 = vmatprep.subr.mxu1 %v1966_v33  ;;  %v4164_v33 = vld [vmem:[%s6487_s7 + $0x348] sm:$0xff] }
 0x511   : > { %2220 = vmatpush1.msra.mxu1 %v1965_v34  ;;  %v4162_v34 = vld [vmem:[%s6487_s7 + $0x338] sm:$0xff] }
 0x512   : > { %2221 = vmatprep.subr.mxu1 %v1964_v35  ;;  %v4126_v35 = vld [vmem:[%s6487_s7 + $0x260] sm:$0xff] }
 0x513   : > { %2222 = vmatpush1.msra.mxu1 %v1963_v36  ;;  %v4161_v36 = vld [vmem:[%s6487_s7 + $0x330] sm:$0xff] }
 0x514   : > { %2223 = vmatprep.subr.mxu1 %v1962_v38  ;;  %v4125_v38 = vld [vmem:[%s6487_s7 + $0x258] sm:$0xff] }
 0x515   : > { %2224 = vmatpush1.msra.mxu1 %v1961_v40  ;;  %v4160_v40 = vld [vmem:[%s6487_s7 + $0x328] sm:$0xff] }
 0x516   : > { %2225 = vmatprep.subr.mxu1 %v1960_v42  ;;  %v4124_v42 = vld [vmem:[%s6487_s7 + $0x250] sm:$0xff] }
 0x517   : > { %2226 = vmatpush1.msra.mxu1 %v1959_v43  ;;  %v4159_v43 = vld [vmem:[%s6487_s7 + $0x320] sm:$0xff] }
 0x518   : > { %4078 = vmatmul.mubr.msk.f32.vlgmr.msra.gmra.mxu1 %vm2093_vm5, %v5539_v18  ;;  %4138 = vmatprep.subr.msk.mxu1 %vm2100_vm2, %v4137_v10 }
 0x519   : > { %2265 = vmatprep.mubr.f32.mxu1 %v4799_v24  ;;  %4139 = vmatpush1.msk.msra.mxu1 %vm2100_vm2, %v4136_v11 }
 0x51a   : > { %2603 = vmatprep.subr.mxu1 %v4135_v63 }
 0x51b   : > { %2604 = vmatpush1.msra.mxu1 %v4134_v12 }
 0x51c   : > { %4079 = vmatmul.mubr.msk.f32.gmra.mxu1 %vm2093_vm5, %v5537_v1  ;;  %2605 = vmatprep.subr.mxu1 %v4133_v13 }
 0x51d   : > { %2655 = vmatprep.mubr.f32.mxu1 %v4799_v24  ;;  %2606 = vmatpush1.msra.mxu1 %v4132_v14 }
 0x51e   : > { %2607 = vmatprep.subr.mxu1 %v4131_v15 }
 0x51f   : > { %2608 = vmatpush1.msra.mxu1 %v4130_v16 }
 0x520   : > { %2609 = vmatprep.subr.mxu1 %v4129_v17 }
 0x521   : > { %2610 = vmatpush1.msra.mxu1 %v4128_v19 }
 0x522   : > { %2611 = vmatprep.subr.mxu1 %v4127_v20 }
 0x523   : > { %2612 = vmatpush1.msra.mxu1 %v4126_v35  ;;  %v2900_v35 = vld [vmem:[%s6489_s9 + $0x40] sm:$0xff] }
 0x524   : > { %2613 = vmatprep.subr.mxu1 %v4125_v38  ;;  %v2899_v38 = vld [vmem:[%s6489_s9 + $0x38] sm:$0xff] }
 0x525   : > { %2614 = vmatpush1.msra.mxu1 %v4124_v42  ;;  %v2898_v42 = vld [vmem:[%s6489_s9 + $0x30] sm:$0xff] }
 0x5c2   : > { %v4487_v44 = vpop.f32.mrf.mxu1 }
 0x5c4   : > { %v2061_v46 = vpop.f32.mrf.mxu1 }
 0x5c5   : > { %4074 = vmatmul.mubr.msk.f32.vlgmr.msra.gmra.mxu0 %vm2093_vm5, %v2061_v46  ;;  %v4158_v46 = vld [vmem:[%s6487_s7 + $0x318] sm:$0xff] }
 0x5c6   : > { %4489 = vmatpush3.msk.msra.mxu0 %vm1991_vm4, %v5537_v1  ;;  %2177 = vmatprep.mubr.f32.mxu0 %v4799_v24 }
 0x5c7   : > { %4490 = vmatprep.subr.mxu0 %v5539_v18 }
 0x5c8   : > { %4491 = vmatpush3.msra.mxu0 %v5539_v18 }
 0x5c9   : > { %4075 = vmatmul.mubr.msk.f32.gmra.mxu0 %vm2093_vm5, %v4487_v44  ;;  %4107 = vmatprep.subr.msk.mxu0 %vm2100_vm2, %v4106_v47  ;;  %v4123_v44 = vld [vmem:[%s6487_s7 + $0x248] sm:$0xff]  ;;  %v4122_v47 = vld [vmem:[%s6487_s7 + $0x240] sm:$0xff] }
 0x5ca   : > { %4492 = vmatprep.mubr.msk.f32.mxu0 %vm1984_vm3, %v4080_v49  ;;  %2615 = vmatprep.subr.mxu1 %v4123_v44  ;;  %v4157_v49 = vld [vmem:[%s6487_s7 + $0x310] sm:$0xff]  ;;  %v2897_v44 = vld [vmem:[%s6489_s9 + $0x28] sm:$0xff] }
 0x5cb   : > { %2616 = vmatpush1.msra.mxu1 %v4122_v47  ;;  %v2896_v47 = vld [vmem:[%s6489_s9 + $0x20] sm:$0xff] }
 0x5cd   : > { %4493 = vmatmul.mubr.msk.f32.vlgmr.msra.gmra.mxu0 %vm1984_vm3, %v4081_v50  ;;  %v4121_v50 = vld [vmem:[%s6487_s7 + $0x238] sm:$0xff] }
 0x5ce   : > { %4108 = vmatpush1.msk.msra.mxu0 %vm2100_vm2, %v4105_v52  ;;  %2455 = vmatprep.mubr.f32.mxu0 %v4799_v24  ;;  %v4156_v52 = vld [vmem:[%s6487_s7 + $0x308] sm:$0xff] }
 0x5cf   : > { %2403 = vmatprep.subr.mxu0 %v4104_v61  ;;  %2617 = vmatprep.subr.mxu1 %v4121_v50  ;;  %v4120_v61 = vld [vmem:[%s6487_s7 + $0x230] sm:$0xff]  ;;  %v2895_v50 = vld [vmem:[%s6489_s9 + $0x18] sm:$0xff] }
 0x5d0   : > { %2404 = vmatpush1.msra.mxu0 %v4103_v53  ;;  %v4155_v53 = vld [vmem:[%s6487_s7 + $0x300] sm:$0xff]  ;;  %2618 = vmatpush1.msra.mxu1 %v4120_v61  ;;  %v2894_v61 = vld [vmem:[%s6489_s9 + $0x10] sm:$0xff] }
 0x5d1   : > { %2405 = vmatprep.subr.mxu0 %v4102_v54  ;;  %v4119_v54 = vld [vmem:[%s6487_s7 + $0x228] sm:$0xff] }
 0x5d2   : > { %2406 = vmatpush1.msra.mxu0 %v4101_v0  ;;  %v4154_v0 = vld [vmem:[%s6487_s7 + $0x2f8] sm:$0xff]  ;;  %2619 = vmatprep.subr.mxu1 %v4119_v54  ;;  %v2893_v54 = vld [vmem:[%s6489_s9 + $0x8] sm:$0xff] }
 0x5d3   : > { %2407 = vmatprep.subr.mxu0 %v4100_v55  ;;  %v4118_v55 = vld [vmem:[%s6487_s7 + $0x220] sm:$0xff] }
 0x5d4   : > { %2408 = vmatpush1.msra.mxu0 %v4099_v2  ;;  %v4153_v2 = vld [vmem:[%s6487_s7 + $0x2f0] sm:$0xff]  ;;  %2620 = vmatpush1.msra.mxu1 %v4118_v55  ;;  %v2892_v55 = vld [vmem:[%s6489_s9] sm:$0xff] }
 0x5d5   : > { %2409 = vmatprep.subr.mxu0 %v4098_v45  ;;  %v4117_v45 = vld [vmem:[%s6487_s7 + $0x218] sm:$0xff] }
 0x5d6   : > { %2410 = vmatpush1.msra.mxu0 %v4097_v56  ;;  %v4152_v56 = vld [vmem:[%s6487_s7 + $0x2e8] sm:$0xff]  ;;  %2621 = vmatprep.subr.mxu1 %v4117_v45  ;;  %v2911_v45 = vld [vmem:[%s6489_s9 + $0x98] sm:$0xff] }
 0x5d7   : > { %2411 = vmatprep.subr.mxu0 %v4096_v4  ;;  %v4116_v4 = vld [vmem:[%s6487_s7 + $0x210] sm:$0xff] }
 0x5d8   : > { %2412 = vmatpush1.msra.mxu0 %v4095_v57  ;;  %v4151_v57 = vld [vmem:[%s6487_s7 + $0x2e0] sm:$0xff]  ;;  %2622 = vmatpush1.msra.mxu1 %v4116_v4  ;;  %v2910_v4 = vld [vmem:[%s6489_s9 + $0x90] sm:$0xff] }
 0x5d9   : > { %2413 = vmatprep.subr.mxu0 %v4094_v48  ;;  %v4150_v48 = vld [vmem:[%s6487_s7 + $0x2d8] sm:$0xff]  ;;  %2918 = vmatprep.subr.mxu1 %v4799_v24 }
 0x5da   : > { %2414 = vmatpush1.msra.mxu0 %v4093_v58  ;;  %v4149_v58 = vld [vmem:[%s6487_s7 + $0x2d0] sm:$0xff] }
 0x5db   : > { %2415 = vmatprep.subr.mxu0 %v4092_v6  ;;  %v4148_v6 = vld [vmem:[%s6487_s7 + $0x2c8] sm:$0xff] }
 0x5dc   : > { %2416 = vmatpush1.msra.mxu0 %v4091_v59  ;;  %v4147_v59 = vld [vmem:[%s6487_s7 + $0x2c0] sm:$0xff] }
 0x5dd   : > { %2417 = vmatprep.subr.mxu0 %v4090_v60  ;;  %v2261_v60 = vpop.f32.mrf.mxu1 }
 0x5de   : > { %2418 = vmatpush1.msra.mxu0 %v4089_v7 }
 0x5df   : > { %2419 = vmatprep.subr.mxu0 %v4088_v8  ;;  %v2263_v7 = vpop.f32.mrf.mxu1 }
 0x5e0   : > { %2420 = vmatpush1.msra.mxu0 %v4087_v51 }
 0x5e1   : > { %2421 = vmatprep.subr.mxu0 %v4086_v9  ;;  %v2267_v51 = vpop.f32.mrf.mxu1 }
 0x5e2   : > { %2422 = vmatpush1.msra.mxu0 %v4085_v62 }
 0x5e3   : > { %4495 = vmatprep.subr.msk.mxu0 %vm1991_vm4, %v5537_v1  ;;  %v2269_v13 = vpop.f32.mrf.mxu1 }
 0x685   : > { %v5749_v21 = vpop.f32.mrf.mxu0 }
 0x686   : > { %v2262_v8 = vadd.f32 %v2261_v60, %v5749_v21  ;;  %v2907_v21 = vld [vmem:[%s6489_s9 + $0x78] sm:$0xff] }
 0x687   : > { %v5751_v3 = vpop.f32.mrf.mxu0 }
 0x688   : > { %v2264_v62 = vadd.f32 %v2263_v7, %v5751_v3  ;;  %v2872_v7 = vld [vmem:[%s6488_s8] sm:$0x3] }
 0x689   : > { %v5753_v22 = vpop.f32.mrf.mxu0 }
 0x68a   : > { %v2268_v63 = vadd.f32 %v2267_v51, %v5753_v22  ;;  %v2906_v22 = vld [vmem:[%s6489_s9 + $0x70] sm:$0xff] }
 0x68b   : > { %v5755_v5 = vpop.f32.mrf.mxu0 }
 0x68c   : > { %v2270_v15 = vadd.f32 %v2269_v13, %v5755_v5  ;;  %v4190_v5 = vld [vmem:[%s6489_s9 + $0x118] sm:$0xff] }
 0x68d   : > { %v4494_v23 = vpop.f32.mrf.mxu0 }
 0x68f   : > { %v2347_v25 = vpop.f32.mrf.mxu0 }
 0x690   : > { %4109 = vmatmul.mubr.msk.f32.vlgmr.msra.gmra.mxu0 %vm2093_vm5, %v2347_v25 }
 0x691   : > { %4496 = vmatpush3.msk.msra.mxu0 %vm1991_vm4, %v5537_v1  ;;  %2461 = vmatprep.mubr.f32.mxu0 %v4799_v24 }
 0x692   : > { %4497 = vmatprep.subr.mxu0 %v5539_v18 }
 0x693   : > { %4498 = vmatpush3.msra.mxu0 %v5539_v18 }
 0x694   : > { %4502 = vmatprep.subr.msk.mxu0 %vm1991_vm4, %v5537_v1  ;;  %4110 = vmatmul.mubr.msk.f32.gmra.mxu0 %vm2093_vm5, %v4494_v23 }
 0x695   : > { %4499 = vmatprep.mubr.msk.f32.mxu0 %vm1984_vm3, %v4111_v26  ;;  %v4189_v26 = vld [vmem:[%s6489_s9 + $0x110] sm:$0xff] }
 0x698   : > { %4500 = vmatmul.mubr.msk.f32.vlgmr.msra.gmra.mxu0 %vm1984_vm3, %v4112_v27  ;;  %v2905_v27 = vld [vmem:[%s6489_s9 + $0x68] sm:$0xff] }
 0x699   : > { %4503 = vmatpush3.msk.msra.mxu0 %vm1991_vm4, %v5537_v1  ;;  %4506 = vmatprep.mubr.msk.f32.mxu0 %vm1984_vm3, %v4142_v28  ;;  %v4166_v1 = vld [vmem:[%s6487_s7 + $0x358] sm:$0xff]  ;;  %v4188_v28 = vld [vmem:[%s6489_s9 + $0x108] sm:$0xff] }
 0x69a   : > { %4504 = vmatprep.subr.mxu0 %v5539_v18 }
 0x69b   : > { %4505 = vmatpush3.msra.mxu0 %v5539_v18  ;;  %v4163_v18 = vld [vmem:[%s6487_s7 + $0x340] sm:$0xff] }
 0x69c   : > { %4507 = vmatmul.mubr.msk.f32.vlgmr.msra.gmra.mxu0 %vm1984_vm3, %v4143_v29  ;;  %4169 = vmatprep.subr.msk.mxu0 %vm2100_vm2, %v4168_v30  ;;  %v2904_v29 = vld [vmem:[%s6489_s9 + $0x60] sm:$0xff] }
 0x69d   : > { %4170 = vmatpush1.msk.msra.mxu0 %vm2100_vm2, %v4167_v31  ;;  %2855 = vmatprep.mubr.f32.mxu0 %v4799_v24  ;;  %v4187_v30 = vld [vmem:[%s6489_s9 + $0x100] sm:$0xff]  ;;  %v2903_v31 = vld [vmem:[%s6489_s9 + $0x58] sm:$0xff] }
 0x69e   : > { %2803 = vmatprep.subr.mxu0 %v4166_v1  ;;  %v4186_v1 = vld [vmem:[%s6489_s9 + $0xf8] sm:$0xff] }
 0x69f   : > { %2804 = vmatpush1.msra.mxu0 %v4165_v32  ;;  %v2902_v32 = vld [vmem:[%s6489_s9 + $0x50] sm:$0xff] }
 0x6a0   : > { %2805 = vmatprep.subr.mxu0 %v4164_v33  ;;  %v4185_v33 = vld [vmem:[%s6489_s9 + $0xf0] sm:$0xff] }
 0x6a1   : > { %2806 = vmatpush1.msra.mxu0 %v4163_v18  ;;  %v2901_v18 = vld [vmem:[%s6489_s9 + $0x48] sm:$0xff] }
 0x6a2   : > { %2807 = vmatprep.subr.mxu0 %v4162_v34  ;;  %v4184_v34 = vld [vmem:[%s6489_s9 + $0xe8] sm:$0xff] }
 0x6a3   : > { %2808 = vmatpush1.msra.mxu0 %v4161_v36  ;;  %v4183_v36 = vld [vmem:[%s6489_s9 + $0xe0] sm:$0xff] }
 0x6a4   : > { %2809 = vmatprep.subr.mxu0 %v4160_v40  ;;  %v4182_v40 = vld [vmem:[%s6489_s9 + $0xd8] sm:$0xff] }
 0x6a5   : > { %2810 = vmatpush1.msra.mxu0 %v4159_v43  ;;  %v4181_v43 = vld [vmem:[%s6489_s9 + $0xd0] sm:$0xff] }
 0x6a6   : > { %2811 = vmatprep.subr.mxu0 %v4158_v46  ;;  %v4180_v46 = vld [vmem:[%s6489_s9 + $0xc8] sm:$0xff] }
 0x6a7   : > { %2812 = vmatpush1.msra.mxu0 %v4157_v49  ;;  %v4179_v49 = vld [vmem:[%s6489_s9 + $0xc0] sm:$0xff] }
 0x6a8   : > { %2813 = vmatprep.subr.mxu0 %v4156_v52  ;;  %v4178_v52 = vld [vmem:[%s6489_s9 + $0xb8] sm:$0xff] }
 0x6a9   : > { %2814 = vmatpush1.msra.mxu0 %v4155_v53  ;;  %v4177_v53 = vld [vmem:[%s6489_s9 + $0xb0] sm:$0xff] }
 0x6aa   : > { %2815 = vmatprep.subr.mxu0 %v4154_v0  ;;  %v4176_v0 = vld [vmem:[%s6489_s9 + $0xa8] sm:$0xff] }
 0x6ab   : > { %2816 = vmatpush1.msra.mxu0 %v4153_v2  ;;  %v4175_v2 = vld [vmem:[%s6489_s9 + $0xa0] sm:$0xff] }
 0x6ac   : > { %2817 = vmatprep.subr.mxu0 %v4152_v56  ;;  %v4194_v56 = vld [vmem:[%s6489_s9 + $0x138] sm:$0xff] }
 0x6ad   : > { %2818 = vmatpush1.msra.mxu0 %v4151_v57  ;;  %v4193_v57 = vld [vmem:[%s6489_s9 + $0x130] sm:$0xff] }
 0x6ae   : > { %2819 = vmatprep.subr.mxu0 %v4150_v48  ;;  %v2909_v48 = vld [vmem:[%s6489_s9 + $0x88] sm:$0xff] }
 0x6af   : > { %2820 = vmatpush1.msra.mxu0 %v4149_v58  ;;  %v4192_v58 = vld [vmem:[%s6489_s9 + $0x128] sm:$0xff] }
 0x6b0   : > { %2821 = vmatprep.subr.mxu0 %v4148_v6  ;;  %v2908_v6 = vld [vmem:[%s6489_s9 + $0x80] sm:$0xff] }
 0x6b1   : > { %2822 = vmatpush1.msra.mxu0 %v4147_v59  ;;  %v4191_v59 = vld [vmem:[%s6489_s9 + $0x120] sm:$0xff] }
 0x6b2   : > { %3014 = vmatprep.subr.mxu0 %v4799_v24 }
 0x750   : > { %v2457_v9 = vpop.f32.mrf.mxu0 }
 0x751   : > { %v5892_v10 = vadd.f32 %v2457_v9, %v2262_v8 }
 0x752   : > { %v2459_v11 = vpop.f32.mrf.mxu0 }
 0x753   : > { %v5895_v12 = vadd.f32 %v2459_v11, %v2264_v62  ;;  %v2877_v11 = vrot.slane %v2872_v7, %v1536_v39 }
 0x754   : > { %v2463_v14 = vpop.f32.mrf.mxu0 }
 0x755   : > { %v5898_v16 = vadd.f32 %v2463_v14, %v2268_v63  ;;  %v2881_v14 = vrot.slane %v2872_v7, %v1540_v41 }
 0x756   : > { %v2465_v17 = vpop.f32.mrf.mxu0 }
 0x757   : > { %v5900_v19 = vadd.f32 %v2465_v17, %v2270_v15 }
 0x758   : > { %v4501_v20 = vpop.f32.mrf.mxu0 }
 0x75a   : > { %v2547_v3 = vpop.f32.mrf.mxu0 }
 0x75b   : > { %4140 = vmatmul.mubr.msk.f32.vlgmr.msra.gmra.mxu1 %vm2093_vm5, %v2547_v3 }
 0x75c   : > { %v4508_v23 = vpop.f32.mrf.mxu0  ;;  %2661 = vmatprep.mubr.f32.mxu1 %v4799_v24  ;;  %2919 = vmatpush1.msra.mxu1 %v2907_v21 }
 0x75d   : > { %2920 = vmatprep.subr.mxu1 %v4799_v24 }
 0x75e   : > { %v2747_v25 = vpop.f32.mrf.mxu0  ;;  %2921 = vmatpush1.msra.mxu1 %v2906_v22 }
 0x75f   : > { %4141 = vmatmul.mubr.msk.f32.gmra.mxu1 %vm2093_vm5, %v4501_v20  ;;  %4171 = vmatmul.mubr.msk.f32.vlgmr.msra.gmra.mxu0 %vm2093_vm5, %v2747_v25 }
 0x760   : > { %2861 = vmatprep.mubr.f32.mxu0 %v4799_v24  ;;  %3015 = vmatpush1.msra.mxu0 %v4190_v5 }
 0x761   : > { %3016 = vmatprep.subr.mxu0 %v4799_v24  ;;  %2922 = vmatprep.subr.mxu1 %v4799_v24 }
 0x762   : > { %3017 = vmatpush1.msra.mxu0 %v4189_v26  ;;  %2923 = vmatpush1.msra.mxu1 %v2905_v27 }
 0x763   : > { %4172 = vmatmul.mubr.msk.f32.gmra.mxu0 %vm2093_vm5, %v4508_v23  ;;  %3018 = vmatprep.subr.mxu0 %v4799_v24 }
 0x764   : > { %3019 = vmatpush1.msra.mxu0 %v4188_v28  ;;  %2924 = vmatprep.subr.mxu1 %v4799_v24 }
 0x765   : > { %3020 = vmatprep.subr.mxu0 %v4799_v24  ;;  %2925 = vmatpush1.msra.mxu1 %v2904_v29  ;;  %v4210_v29 = vld [vmem:[%s6491_s11 + $0x88] sm:$0xff] }
 0x766   : > { %3021 = vmatpush1.msra.mxu0 %v4187_v30  ;;  %2926 = vmatprep.subr.mxu1 %v4799_v24  ;;  %v4209_v30 = vld [vmem:[%s6491_s11 + $0x80] sm:$0xff] }
 0x767   : > { %3022 = vmatprep.subr.mxu0 %v4799_v24  ;;  %2927 = vmatpush1.msra.mxu1 %v2903_v31  ;;  %v4208_v31 = vld [vmem:[%s6491_s11 + $0x78] sm:$0xff] }
 0x768   : > { %3023 = vmatpush1.msra.mxu0 %v4186_v1  ;;  %2928 = vmatprep.subr.mxu1 %v4799_v24  ;;  %v4207_v1 = vld [vmem:[%s6491_s11 + $0x70] sm:$0xff] }
 0x769   : > { %3024 = vmatprep.subr.mxu0 %v4799_v24  ;;  %2929 = vmatpush1.msra.mxu1 %v2902_v32 }
 0x76a   : > { %3025 = vmatpush1.msra.mxu0 %v4185_v33  ;;  %2930 = vmatprep.subr.mxu1 %v4799_v24 }
 0x76b   : > { %3026 = vmatprep.subr.mxu0 %v4799_v24  ;;  %2931 = vmatpush1.msra.mxu1 %v2901_v18 }
 0x76c   : > { %3027 = vmatpush1.msra.mxu0 %v4184_v34  ;;  %2932 = vmatprep.subr.mxu1 %v4799_v24 }
 0x76d   : > { %3028 = vmatprep.subr.mxu0 %v4799_v24  ;;  %2933 = vmatpush1.msra.mxu1 %v2900_v35 }
 0x76e   : > { %3029 = vmatpush1.msra.mxu0 %v4183_v36  ;;  %2934 = vmatprep.subr.mxu1 %v4799_v24 }
 0x76f   : > { %3030 = vmatprep.subr.mxu0 %v4799_v24  ;;  %2935 = vmatpush1.msra.mxu1 %v2899_v38 }
 0x770   : > { %3031 = vmatpush1.msra.mxu0 %v4182_v40  ;;  %2936 = vmatprep.subr.mxu1 %v4799_v24 }
 0x771   : > { %3032 = vmatprep.subr.mxu0 %v4799_v24  ;;  %2937 = vmatpush1.msra.mxu1 %v2898_v42 }
 0x772   : > { %3033 = vmatpush1.msra.mxu0 %v4181_v43  ;;  %2938 = vmatprep.subr.mxu1 %v4799_v24 }
 0x773   : > { %3034 = vmatprep.subr.mxu0 %v4799_v24  ;;  %2939 = vmatpush1.msra.mxu1 %v2897_v44  ;;  %v3091_v44 = vld [vmem:[%s6490_s10] sm:$0x1f] }
 0x774   : > { %3035 = vmatpush1.msra.mxu0 %v4180_v46  ;;  %2940 = vmatprep.subr.mxu1 %v4799_v24  ;;  %v4199_v46 = vld [vmem:[%s6490_s10 + $0x8] sm:$0x1f] }
 0x775   : > { %3036 = vmatprep.subr.mxu0 %v4799_v24  ;;  %2941 = vmatpush1.msra.mxu1 %v2896_v47  ;;  %v3254_v47 = vld [vmem:[%s6491_s11 + $0x48] sm:$0xff] }
 0x776   : > { %3037 = vmatpush1.msra.mxu0 %v4179_v49  ;;  %2942 = vmatprep.subr.mxu1 %v4799_v24  ;;  %v3253_v49 = vld [vmem:[%s6491_s11 + $0x40] sm:$0xff] }
 0x777   : > { %3038 = vmatprep.subr.mxu0 %v4799_v24  ;;  %2943 = vmatpush1.msra.mxu1 %v2895_v50  ;;  %v3252_v50 = vld [vmem:[%s6491_s11 + $0x38] sm:$0xff] }
 0x778   : > { %3039 = vmatpush1.msra.mxu0 %v4178_v52  ;;  %2944 = vmatprep.subr.mxu1 %v4799_v24  ;;  %v3251_v52 = vld [vmem:[%s6491_s11 + $0x30] sm:$0xff] }
 0x779   : > { %3040 = vmatprep.subr.mxu0 %v4799_v24  ;;  %2945 = vmatpush1.msra.mxu1 %v2894_v61  ;;  %v3250_v61 = vld [vmem:[%s6491_s11 + $0x28] sm:$0xff] }
 0x77a   : > { %3041 = vmatpush1.msra.mxu0 %v4177_v53  ;;  %2946 = vmatprep.subr.mxu1 %v4799_v24  ;;  %v3249_v53 = vld [vmem:[%s6491_s11 + $0x20] sm:$0xff] }
 0x77b   : > { %3042 = vmatprep.subr.mxu0 %v4799_v24  ;;  %2947 = vmatpush1.msra.mxu1 %v2893_v54  ;;  %v3248_v54 = vld [vmem:[%s6491_s11 + $0x18] sm:$0xff] }
 0x77c   : > { %3043 = vmatpush1.msra.mxu0 %v4176_v0  ;;  %2948 = vmatprep.subr.mxu1 %v4799_v24  ;;  %v3247_v0 = vld [vmem:[%s6491_s11 + $0x10] sm:$0xff] }
 0x77d   : > { %3044 = vmatprep.subr.mxu0 %v4799_v24  ;;  %2949 = vmatpush1.msra.mxu1 %v2892_v55  ;;  %v4206_v55 = vld [vmem:[%s6491_s11 + $0x68] sm:$0xff] }
 0x77e   : > { %3045 = vmatpush1.msra.mxu0 %v4175_v2  ;;  %2974 = vmatprep.subr.mxu1 %v4799_v24  ;;  %v3246_v2 = vld [vmem:[%s6491_s11 + $0x8] sm:$0xff] }
 0x77f   : > { %3070 = vmatprep.subr.mxu0 %v4799_v24  ;;  %2975 = vmatpush2.msra.mxu1 %v2911_v45  ;;  %v4205_v45 = vld [vmem:[%s6491_s11 + $0x60] sm:$0xff] }
 0x780   : > { %3071 = vmatpush2.msra.mxu0 %v4194_v56  ;;  %2976 = vmatprep.subr.mxu1 %v4799_v24  ;;  %v3245_v56 = vld [vmem:[%s6491_s11] sm:$0xff] }
 0x781   : > { %3072 = vmatprep.subr.mxu0 %v4799_v24  ;;  %2977 = vmatpush2.msra.mxu1 %v2910_v4  ;;  %v4204_v4 = vld [vmem:[%s6491_s11 + $0x58] sm:$0xff] }
 0x782   : > { %3073 = vmatpush2.msra.mxu0 %v4193_v57  ;;  %2978 = vmatprep.subr.mxu1 %v4799_v24  ;;  %v4203_v57 = vld [vmem:[%s6491_s11 + $0x50] sm:$0xff] }
 0x783   : > { %3074 = vmatprep.subr.mxu0 %v4799_v24  ;;  %2979 = vmatpush2.msra.mxu1 %v2909_v48 }
 0x784   : > { %3075 = vmatpush2.msra.mxu0 %v4192_v58  ;;  %2980 = vmatprep.subr.mxu1 %v4799_v24 }
 0x785   : > { %3076 = vmatprep.subr.mxu0 %v4799_v24  ;;  %2981 = vmatpush2.msra.mxu1 %v2908_v6 }
 0x786   : > { %3077 = vmatpush2.msra.mxu0 %v4191_v59  ;;  %4509 = vmatprep.subr.mxu1 %v4799_v24 }
 0x787   : > { %4546 = vmatprep.subr.mxu0 %v4799_v24 }
 0x81b   : > { %v2657_v60 = vpop.f32.mrf.mxu1 }
 0x81c   : > { %v2668_v51 = vadd.f32 %v2657_v60, %v5892_v10  ;;  %v4223_v60 = vld [vmem:[%s6491_s11 + $0xe8] sm:$0xff] }
 0x81d   : > { %v2659_v8 = vpop.f32.mrf.mxu1 }
 0x81e   : > { %v2669_v63 = vadd.f32 %v2659_v8, %v5895_v12 }
 0x81f   : > { %v2663_v9 = vpop.f32.mrf.mxu1  ;;  %v2857_v62 = vpop.f32.mrf.mxu0 }
 0x820   : > { %v2868_v13 = vadd.f32 %v2857_v62, %v2668_v51  ;;  %v2670_v20 = vadd.f32 %v2663_v9, %v5898_v16  ;;  %v4212_v16 = vld [vmem:[%s6491_s11 + $0x98] sm:$0xff]  ;;  %v4222_v51 = vld [vmem:[%s6491_s11 + $0xe0] sm:$0xff] }
 0x821   : > { %v2665_v15 = vpop.f32.mrf.mxu1  ;;  %v2859_v17 = vpop.f32.mrf.mxu0  ;;  %v4234_v9 = vld [vmem:[%s6491_s11 + $0x138] sm:$0xff] }
 0x822   : > { %v2869_v21 = vadd.f32 %v2859_v17, %v2669_v63  ;;  %v2884_v3 = vadd.f32 %v2877_v11, %v2868_v13  ;;  %v2671_v10 = vadd.f32 %v2665_v15, %v5900_v19  ;;  %v4211_v19 = vld [vmem:[%s6491_s11 + $0x90] sm:$0xff]  ;;  %v4221_v62 = vld [vmem:[%s6491_s11 + $0xd8] sm:$0xff]  ;;  %v4232_v13 = vld [vmem:[%s6491_s11 + $0x128] sm:$0xff] }
 0x823   : > { %v2863_v22 = vpop.f32.mrf.mxu0  ;;  %v4220_v63 = vld [vmem:[%s6491_s11 + $0xd0] sm:$0xff]  ;;  %v4231_v15 = vld [vmem:[%s6491_s11 + $0x120] sm:$0xff] }
 0x824   : > { %v2885_v23 = vadd.f32 %v2881_v14, %v2869_v21  ;;  %v2870_v5 = vadd.f32 %v2863_v22, %v2670_v20  ;;  %v2888_v27 = vmax.f32 %v2884_v3, 0.0  ;;  %v4218_v17 = vld [vmem:[%s6491_s11 + $0xc0] sm:$0xff]  ;;  %v4230_v20 = vld [vmem:[%s6491_s11 + $0x118] sm:$0xff]  ;;  %v4229_v3 = vld [vmem:[%s6491_s11 + $0x110] sm:$0xff] }
 0x825   : > { %v2865_v25 = vpop.f32.mrf.mxu0  ;;  %v4217_v21 = vld [vmem:[%s6491_s11 + $0xb8] sm:$0xff]  ;;  %v4216_v22 = vld [vmem:[%s6491_s11 + $0xb0] sm:$0xff] }
 0x826   : > { %v2889_v26 = vmax.f32 %v2885_v23, 0.0  ;;  %v2871_v39 = vadd.f32 %v2865_v25, %v2671_v10  ;;  %v2886_v12 = vadd.f32 %v2877_v11, %v2870_v5  ;;  %v4233_v11 = vld [vmem:[%s6491_s11 + $0x130] sm:$0xff]  ;;  %v4228_v10 = vld [vmem:[%s6491_s11 + $0x108] sm:$0xff]  ;;  %v4227_v5 = vld [vmem:[%s6491_s11 + $0x100] sm:$0xff] }
 0x827   : > { %v4215_v23 = vld [vmem:[%s6491_s11 + $0xa8] sm:$0xff]  ;;  %v4214_v25 = vld [vmem:[%s6491_s11 + $0xa0] sm:$0xff] }
 0x828   : > { %v2887_v28 = vadd.f32 %v2881_v14, %v2871_v39  ;;  %4173 = vmatprep.mubr.msk.f32.mxu1 %vm563_vm0, %v2889_v26  ;;  %4195 = vmatprep.mubr.msk.f32.mxu0 %vm563_vm0, %v2889_v26  ;;  %v2890_v41 = vmax.f32 %v2886_v12, 0.0  ;;  %v4219_v14 = vld [vmem:[%s6491_s11 + $0xc8] sm:$0xff]  ;;  %v4226_v26 = vld [vmem:[%s6491_s11 + $0xf8] sm:$0xff] }
 0x829   : > { %2983 = vmatmul.mubr.f32.vlgmr.msra.gmra.mxu1 %v2888_v27  ;;  %3079 = vmatmul.mubr.f32.vlgmr.msra.gmra.mxu0 %v2888_v27  ;;  %v4225_v27 = vld [vmem:[%s6491_s11 + $0xf0] sm:$0xff]  ;;  %v4245_v12 = vld [vmem:[%s6491_s11 + $0x188] sm:$0xff] }
 0x82a   : > { %v2891_v37 = vmax.f32 %v2887_v28, 0.0  ;;  %4547 = vmatpush3.msra.mxu0 %v4212_v16  ;;  %v4242_v16 = vld [vmem:[%s6491_s11 + $0x170] sm:$0xff] }
 0x82b   : > { %4548 = vmatprep.subr.mxu0 %v4799_v24 }
 0x82c   : > { %4174 = vmatprep.mubr.msk.f32.mxu1 %vm563_vm0, %v2891_v37  ;;  %4196 = vmatprep.mubr.msk.f32.mxu0 %vm563_vm0, %v2891_v37  ;;  %v4244_v37 = vld [vmem:[%s6491_s11 + $0x180] sm:$0xff] }
 0x82d   : > { %2988 = vmatmul.mubr.f32.gmra.mxu1 %v2890_v41  ;;  %3084 = vmatmul.mubr.f32.gmra.mxu0 %v2890_v41  ;;  %v4243_v41 = vld [vmem:[%s6491_s11 + $0x178] sm:$0xff] }
 0x82e   : > { %4513 = vmatprep.mubr.msk.f32.mxu1 %vm4800_vm6, %v4799_v24  ;;  %4566 = vmatprep.mubr.msk.f32.mxu0 %vm4800_vm6, %v4799_v24 }
 0x82f   : > { %4549 = vmatpush3.msra.mxu0 %v4211_v19  ;;  %v4241_v19 = vld [vmem:[%s6491_s11 + $0x168] sm:$0xff] }
 0x830   : > { %4550 = vmatprep.subr.mxu0 %v4799_v24 }
 0x831   : > { %4551 = vmatpush3.msra.mxu0 %v4210_v29  ;;  %v4240_v29 = vld [vmem:[%s6491_s11 + $0x160] sm:$0xff] }
 0x832   : > { %4552 = vmatprep.subr.mxu0 %v4799_v24 }
 0x833   : > { %4553 = vmatpush3.msra.mxu0 %v4209_v30  ;;  %v4239_v30 = vld [vmem:[%s6491_s11 + $0x158] sm:$0xff] }
 0x834   : > { %4554 = vmatprep.subr.mxu0 %v4799_v24 }
 0x835   : > { %4555 = vmatpush3.msra.mxu0 %v4208_v31  ;;  %v4238_v31 = vld [vmem:[%s6491_s11 + $0x150] sm:$0xff] }
 0x836   : > { %4556 = vmatprep.subr.mxu0 %v4799_v24 }
 0x837   : > { %4557 = vmatpush3.msra.mxu0 %v4207_v1  ;;  %v4237_v1 = vld [vmem:[%s6491_s11 + $0x148] sm:$0xff] }
 0x838   : > { %4558 = vmatprep.subr.mxu0 %v4799_v24 }
 0x839   : > { %4559 = vmatpush3.msra.mxu0 %v4206_v55  ;;  %v3769_v55 = vld [vmem:[%s6495_s15 + $0x38] sm:$0xff] }
 0x83a   : > { %4560 = vmatprep.subr.mxu0 %v4799_v24 }
 0x83b   : > { %4561 = vmatpush3.msra.mxu0 %v4205_v45  ;;  %v3767_v45 = vld [vmem:[%s6495_s15 + $0x28] sm:$0xff] }
 0x83c   : > { %4562 = vmatprep.subr.mxu0 %v4799_v24 }
 0x83d   : > { %4563 = vmatpush3.msra.mxu0 %v4204_v4  ;;  %v3765_v4 = vld [vmem:[%s6495_s15 + $0x18] sm:$0xff] }
 0x83e   : > { %4564 = vmatprep.subr.mxu0 %v4799_v24 }
 0x83f   : > { %4565 = vmatpush3.msra.mxu0 %v4203_v57 }
 0x840   : > { %4592 = vmatprep.subr.mxu0 %v4799_v24 }
 0x8e9   : > { %v2984_v32 = vpop.f32.mrf.mxu1  ;;  %v3080_v33 = vpop.f32.mrf.mxu0 }
 0x8ea   : > { %v3089_v43 = vmax.f32 %v2984_v32, %v3080_v33  ;;  %v4236_v32 = vld [vmem:[%s6491_s11 + $0x140] sm:$0xff] }
 0x8eb   : > { %v2986_v18 = vpop.f32.mrf.mxu1  ;;  %v3082_v34 = vpop.f32.mrf.mxu0 }
 0x8ec   : > { %v3685_v18 = vld [vmem:[%s6493_s13 + $0x70] sm:$0xff]  ;;  %v3684_v34 = vld [vmem:[%s6493_s13 + $0x68] sm:$0xff] }
 0x8ed   : > { %v2989_v35 = vpop.f32.mrf.mxu1  ;;  %v3085_v36 = vpop.f32.mrf.mxu0 }
 0x8ee   : > { %v3090_v38 = vmax.f32 %v2989_v35, %v3085_v36  ;;  %v3683_v35 = vld [vmem:[%s6493_s13 + $0x60] sm:$0xff]  ;;  %v3682_v36 = vld [vmem:[%s6493_s13 + $0x58] sm:$0xff] }
 0x8ef   : > { %v2991_v40 = vpop.f32.mrf.mxu1  ;;  %v3087_v42 = vpop.f32.mrf.mxu0 }
 0x8f0   : > { %4510 = vmatpush3.msk.msra.mxu1 %vm1991_vm4, %v3090_v38  ;;  %v3680_v40 = vld [vmem:[%s6493_s13 + $0x48] sm:$0xff]  ;;  %v3679_v42 = vld [vmem:[%s6493_s13 + $0x40] sm:$0xff] }
 0x8f1   : > { %4511 = vmatprep.subr.mxu1 %v4799_v24 }
 0x8f2   : > { %4512 = vmatpush3.msra.mxu1 %v3089_v43 }
 0x8f3   : > { %4514 = vmatmul.mubr.msk.f32.vlgmr.msra.gmra.mxu1 %vm1984_vm3, %v3091_v44  ;;  %4516 = vmatprep.subr.mxu1 %v4799_v24  ;;  %v3677_v44 = vld [vmem:[%s6493_s13 + $0x30] sm:$0xff] }
 0x8f4   : > { %4517 = vmatpush3.msk.msra.mxu1 %vm1991_vm4, %v3090_v38  ;;  %4520 = vmatprep.mubr.msk.f32.mxu1 %vm4800_vm6, %v4799_v24  ;;  %v3681_v38 = vld [vmem:[%s6493_s13 + $0x50] sm:$0xff] }
 0x8f5   : > { %4518 = vmatprep.subr.mxu1 %v4799_v24 }
 0x8f6   : > { %4519 = vmatpush3.msra.mxu1 %v3089_v43  ;;  %v3678_v43 = vld [vmem:[%s6493_s13 + $0x38] sm:$0xff] }
 0x8f7   : > { %4521 = vmatmul.mubr.msk.f32.vlgmr.msra.gmra.mxu1 %vm1984_vm3, %v4199_v46  ;;  %4523 = vmatprep.subr.mxu1 %v4799_v24  ;;  %v3676_v46 = vld [vmem:[%s6493_s13 + $0x28] sm:$0xff] }
 0x8f8   : > { %4524 = vmatpush3.msra.mxu1 %v3254_v47  ;;  %4543 = vmatprep.mubr.msk.f32.mxu1 %vm4800_vm6, %v4799_v24  ;;  %v3675_v47 = vld [vmem:[%s6493_s13 + $0x20] sm:$0xff] }
 0x8f9   : > { %4525 = vmatprep.subr.mxu1 %v4799_v24 }
 0x8fa   : > { %4526 = vmatpush3.msra.mxu1 %v3253_v49  ;;  %v3674_v49 = vld [vmem:[%s6493_s13 + $0x18] sm:$0xff] }
 0x8fb   : > { %4527 = vmatprep.subr.mxu1 %v4799_v24 }
 0x8fc   : > { %4528 = vmatpush3.msra.mxu1 %v3252_v50  ;;  %v3673_v50 = vld [vmem:[%s6493_s13 + $0x10] sm:$0xff] }
 0x8fd   : > { %4529 = vmatprep.subr.mxu1 %v4799_v24 }
 0x8fe   : > { %4530 = vmatpush3.msra.mxu1 %v3251_v52  ;;  %v3672_v52 = vld [vmem:[%s6493_s13 + $0x8] sm:$0xff] }
 0x8ff   : > { %4531 = vmatprep.subr.mxu1 %v4799_v24 }
 0x900   : > { %4532 = vmatpush3.msra.mxu1 %v3250_v61  ;;  %v3671_v61 = vld [vmem:[%s6493_s13] sm:$0xff] }
 0x901   : > { %4533 = vmatprep.subr.mxu1 %v4799_v24 }
 0x902   : > { %4534 = vmatpush3.msra.mxu1 %v3249_v53  ;;  %v3772_v53 = vld [vmem:[%s6495_s15 + $0x50] sm:$0xf] }
 0x903   : > { %4535 = vmatprep.subr.mxu1 %v4799_v24 }
 0x904   : > { %4536 = vmatpush3.msra.mxu1 %v3248_v54  ;;  %v3771_v54 = vld [vmem:[%s6495_s15 + $0x48] sm:$0xff] }
 0x905   : > { %4537 = vmatprep.subr.mxu1 %v4799_v24 }
 0x906   : > { %4538 = vmatpush3.msra.mxu1 %v3247_v0  ;;  %v3770_v0 = vld [vmem:[%s6495_s15 + $0x40] sm:$0xff] }
 0x907   : > { %4539 = vmatprep.subr.mxu1 %v4799_v24 }
 0x908   : > { %4540 = vmatpush3.msra.mxu1 %v3246_v2  ;;  %v3768_v2 = vld [vmem:[%s6495_s15 + $0x30] sm:$0xff] }
 0x909   : > { %4541 = vmatprep.subr.mxu1 %v4799_v24 }
 0x90a   : > { %4542 = vmatpush3.msra.mxu1 %v3245_v56  ;;  %v3766_v56 = vld [vmem:[%s6495_s15 + $0x20] sm:$0xff] }
 0x90b   : > { %4569 = vmatprep.subr.mxu1 %v4799_v24 }
 0x9b3   : > { %v3164_v48 = vpop.f32.mrf.mxu1 }
 0x9b5   : > { %v4515_v58 = vpop.f32.mrf.mxu1 }
 0x9b7   : > { %v3239_v6 = vpop.f32.mrf.mxu1 }
 0x9b8   : > { %v6185_v59 = vmax.f32 %v3164_v48, %v3239_v6 }
 0x9b9   : > { %v4522_v7 = vpop.f32.mrf.mxu1 }
 0x9ba   : > { %v3341_v8 = vrot.slane %v6185_v59, 1  ;;  %4544 = vmatmul.mubr.msk.f32.vlgmr.msra.gmra.mxu1 %vm3255_vm7, %v6185_v59  ;;  %v3426_v39 = vrot.slane %v6185_v59, 2  ;;  %v3511_v28 = vrot.slane %v6185_v59, 3  ;;  %v3596_v33 = vrot.slane %v6185_v59, 4 }
 0x9bb   : > { %4570 = vmatpush3.msra.mxu1 %v4223_v60  ;;  %4589 = vmatprep.mubr.msk.f32.mxu1 %vm4800_vm6, %v4799_v24 }
 0x9bc   : > { %4571 = vmatprep.subr.mxu1 %v4799_v24  ;;  %4567 = vmatmul.mubr.msk.f32.vlgmr.msra.gmra.mxu0 %vm3255_vm7, %v3341_v8 }
 0x9bd   : > { %4572 = vmatpush3.msra.mxu1 %v4222_v51  ;;  %4593 = vmatpush3.msra.mxu0 %v4234_v9  ;;  %v3244_v51 = vld [vmem:[%s6492_s12] sm:$0x1] }
 0x9be   : > { %4573 = vmatprep.subr.mxu1 %v4799_v24  ;;  %4594 = vmatprep.subr.mxu0 %v4799_v24 }
 0x9bf   : > { %4574 = vmatpush3.msra.mxu1 %v4221_v62  ;;  %4595 = vmatpush3.msra.mxu0 %v4233_v11 }
 0x9c0   : > { %4575 = vmatprep.subr.mxu1 %v4799_v24  ;;  %4596 = vmatprep.subr.mxu0 %v4799_v24 }
 0x9c1   : > { %4576 = vmatpush3.msra.mxu1 %v4220_v63  ;;  %4597 = vmatpush3.msra.mxu0 %v4232_v13 }
 0x9c2   : > { %4577 = vmatprep.subr.mxu1 %v4799_v24  ;;  %4598 = vmatprep.subr.mxu0 %v4799_v24 }
 0x9c3   : > { %4578 = vmatpush3.msra.mxu1 %v4219_v14  ;;  %4599 = vmatpush3.msra.mxu0 %v4231_v15 }
 0x9c4   : > { %4579 = vmatprep.subr.mxu1 %v4799_v24  ;;  %4600 = vmatprep.subr.mxu0 %v4799_v24 }
 0x9c5   : > { %4580 = vmatpush3.msra.mxu1 %v4218_v17  ;;  %4601 = vmatpush3.msra.mxu0 %v4230_v20  ;;  %v3764_v20 = vld [vmem:[%s6495_s15 + $0x10] sm:$0xff] }
 0x9c6   : > { %4581 = vmatprep.subr.mxu1 %v4799_v24  ;;  %4602 = vmatprep.subr.mxu0 %v4799_v24 }
 0x9c7   : > { %4582 = vmatpush3.msra.mxu1 %v4217_v21  ;;  %4603 = vmatpush3.msra.mxu0 %v4229_v3  ;;  %v3763_v21 = vld [vmem:[%s6495_s15 + $0x8] sm:$0xff]  ;;  %v3762_v3 = vld [vmem:[%s6495_s15] sm:$0xff] }
 0x9c8   : > { %4583 = vmatprep.subr.mxu1 %v4799_v24  ;;  %4604 = vmatprep.subr.mxu0 %v4799_v24 }
 0x9c9   : > { %4584 = vmatpush3.msra.mxu1 %v4216_v22  ;;  %4605 = vmatpush3.msra.mxu0 %v4228_v10  ;;  %v3686_v22 = vld [vmem:[%s6494_s14] sm:$0x1] }
 0x9ca   : > { %4585 = vmatprep.subr.mxu1 %v4799_v24  ;;  %4606 = vmatprep.subr.mxu0 %v4799_v24 }
 0x9cb   : > { %4586 = vmatpush3.msra.mxu1 %v4215_v23  ;;  %4607 = vmatpush3.msra.mxu0 %v4227_v5 }
 0x9cc   : > { %4587 = vmatprep.subr.mxu1 %v4799_v24  ;;  %4608 = vmatprep.subr.mxu0 %v4799_v24 }
 0x9cd   : > { %4588 = vmatpush3.msra.mxu1 %v4214_v25  ;;  %4609 = vmatpush3.msra.mxu0 %v4226_v26 }
 0x9ce   : > { %4590 = vmatmul.mubr.msk.f32.vlgmr.msra.gmra.mxu1 %vm3255_vm7, %v3426_v39  ;;  %4610 = vmatprep.subr.mxu0 %v4799_v24 }
 0x9cf   : > { %4615 = vmatprep.subr.mxu1 %v4799_v24  ;;  %4611 = vmatpush3.msra.mxu0 %v4225_v27 }
 0x9d0   : > { %4612 = vmatprep.mubr.msk.f32.mxu0 %vm4800_vm6, %v4799_v24  ;;  %4616 = vmatpush3.msra.mxu1 %v4245_v12 }
 0x9d1   : > { %4613 = vmatmul.mubr.msk.f32.vlgmr.msra.gmra.mxu0 %vm3255_vm7, %v3511_v28  ;;  %4617 = vmatprep.subr.mxu1 %v4799_v24 }
 0x9d2   : > { %4618 = vmatpush3.msra.mxu1 %v4244_v37  ;;  %4635 = vmatprep.mubr.msk.f32.mxu1 %vm4800_vm6, %v4799_v24 }
 0x9d3   : > { %4619 = vmatprep.subr.mxu1 %v4799_v24  ;;  %4638 = vmatprep.subr.mxu0 %v4799_v24 }
 0x9d4   : > { %4620 = vmatpush3.msra.mxu1 %v4243_v41  ;;  %4668 = vmatprep.mubr.msk.f32.mxu0 %vm4800_vm6, %v4799_v24 }
 0x9d5   : > { %4621 = vmatprep.subr.mxu1 %v4799_v24  ;;  %4639 = vmatpush3.msra.mxu0 %v3685_v18 }
 0x9d6   : > { %4622 = vmatpush3.msra.mxu1 %v4242_v16  ;;  %4640 = vmatprep.subr.mxu0 %v4799_v24 }
 0x9d7   : > { %4623 = vmatprep.subr.mxu1 %v4799_v24  ;;  %4641 = vmatpush3.msra.mxu0 %v3684_v34 }
 0x9d8   : > { %4624 = vmatpush3.msra.mxu1 %v4241_v19  ;;  %4642 = vmatprep.subr.mxu0 %v4799_v24 }
 0x9d9   : > { %4625 = vmatprep.subr.mxu1 %v4799_v24  ;;  %4643 = vmatpush3.msra.mxu0 %v3683_v35 }
 0x9da   : > { %4626 = vmatpush3.msra.mxu1 %v4240_v29  ;;  %4644 = vmatprep.subr.mxu0 %v4799_v24 }
 0x9db   : > { %4627 = vmatprep.subr.mxu1 %v4799_v24  ;;  %4645 = vmatpush3.msra.mxu0 %v3682_v36 }
 0x9dc   : > { %4628 = vmatpush3.msra.mxu1 %v4239_v30  ;;  %4646 = vmatprep.subr.mxu0 %v4799_v24 }
 0x9dd   : > { %4629 = vmatprep.subr.mxu1 %v4799_v24  ;;  %4647 = vmatpush3.msra.mxu0 %v3681_v38 }
 0x9de   : > { %4630 = vmatpush3.msra.mxu1 %v4238_v31  ;;  %4648 = vmatprep.subr.mxu0 %v4799_v24 }
 0x9df   : > { %4631 = vmatprep.subr.mxu1 %v4799_v24  ;;  %4649 = vmatpush3.msra.mxu0 %v3680_v40 }
 0x9e0   : > { %4632 = vmatpush3.msra.mxu1 %v4237_v1  ;;  %4650 = vmatprep.subr.mxu0 %v4799_v24 }
 0x9e1   : > { %4633 = vmatprep.subr.mxu1 %v4799_v24  ;;  %4651 = vmatpush3.msra.mxu0 %v3679_v42 }
 0x9e2   : > { %4634 = vmatpush3.msra.mxu1 %v4236_v32  ;;  %4652 = vmatprep.subr.mxu0 %v4799_v24 }
 0x9e3   : > { %4636 = vmatmul.mubr.msk.f32.vlgmr.msra.gmra.mxu1 %vm3255_vm7, %v3596_v33  ;;  %4671 = vmatprep.subr.mxu1 %v4799_v24 }
 0x9e4   : > { %4693 = vmatprep.mubr.msk.f32.mxu1 %vm4800_vm6, %v4799_v24  ;;  %4653 = vmatpush3.msra.mxu0 %v3678_v43 }
 0x9e5   : > { %4654 = vmatprep.subr.mxu0 %v4799_v24  ;;  %4672 = vmatpush3.msk.msra.mxu1 %vm2100_vm2, %v3772_v53 }
 0x9e6   : > { %4655 = vmatpush3.msra.mxu0 %v3677_v44  ;;  %4673 = vmatprep.subr.mxu1 %v4799_v24 }
 0x9e7   : > { %4656 = vmatprep.subr.mxu0 %v4799_v24  ;;  %4674 = vmatpush3.msra.mxu1 %v3771_v54 }
 0x9e8   : > { %4657 = vmatpush3.msra.mxu0 %v3676_v46  ;;  %4675 = vmatprep.subr.mxu1 %v4799_v24 }
 0x9e9   : > { %4658 = vmatprep.subr.mxu0 %v4799_v24  ;;  %4676 = vmatpush3.msra.mxu1 %v3770_v0 }
 0x9ea   : > { %4659 = vmatpush3.msra.mxu0 %v3675_v47  ;;  %4677 = vmatprep.subr.mxu1 %v4799_v24 }
 0x9eb   : > { %4660 = vmatprep.subr.mxu0 %v4799_v24  ;;  %4678 = vmatpush3.msra.mxu1 %v3769_v55 }
 0x9ec   : > { %4661 = vmatpush3.msra.mxu0 %v3674_v49  ;;  %4679 = vmatprep.subr.mxu1 %v4799_v24 }
 0x9ed   : > { %4662 = vmatprep.subr.mxu0 %v4799_v24  ;;  %4680 = vmatpush3.msra.mxu1 %v3768_v2 }
 0x9ee   : > { %4663 = vmatpush3.msra.mxu0 %v3673_v50  ;;  %4681 = vmatprep.subr.mxu1 %v4799_v24 }
 0x9ef   : > { %4664 = vmatprep.subr.mxu0 %v4799_v24  ;;  %4682 = vmatpush3.msra.mxu1 %v3767_v45 }
 0x9f0   : > { %4665 = vmatpush3.msra.mxu0 %v3672_v52  ;;  %4683 = vmatprep.subr.mxu1 %v4799_v24 }
 0x9f1   : > { %4666 = vmatprep.subr.mxu0 %v4799_v24  ;;  %4684 = vmatpush3.msra.mxu1 %v3766_v56 }
 0x9f2   : > { %4667 = vmatpush3.msra.mxu0 %v3671_v61  ;;  %4685 = vmatprep.subr.mxu1 %v4799_v24 }
 0x9f3   : > { %4686 = vmatpush3.msra.mxu1 %v3765_v4 }
 0x9f4   : > { %4687 = vmatprep.subr.mxu1 %v4799_v24 }
 0x9f5   : > { %4688 = vmatpush3.msra.mxu1 %v3764_v20 }
 0x9f6   : > { %4689 = vmatprep.subr.mxu1 %v4799_v24 }
 0x9f7   : > { %4690 = vmatpush3.msra.mxu1 %v3763_v21 }
 0x9f8   : > { %4691 = vmatprep.subr.mxu1 %v4799_v24  ;;  %v3773_v24 = vld [vmem:[%s6520_s26] sm:$0x1] }
 0x9f9   : > { %4692 = vmatpush3.msra.mxu1 %v3762_v3 }
 0xa7a   : > { %v3325_v57 = vpop.f32.mrf.mxu1 }
 0xa7b   : > { %v3329_v9 = vadd.f32 %v3325_v57, %v3244_v51 }
 0xa7c   : > { %v4545_v48 = vpop.f32.mrf.mxu1  ;;  %v3410_v58 = vpop.f32.mrf.mxu0 }
 0xa7d   : > { %v3414_v62 = vadd.f32 %v3410_v58, %v3329_v9 }
 0xa7e   : > { %v4568_v6 = vpop.f32.mrf.mxu0 }
 0xa8e   : > { %v3495_v59 = vpop.f32.mrf.mxu1 }
 0xa8f   : > { %v3499_v11 = vadd.f32 %v3495_v59, %v3414_v62 }
 0xa90   : > { %v4591_v60 = vpop.f32.mrf.mxu1 }
 0xa91   : > { %v3580_v7 = vpop.f32.mrf.mxu0 }
 0xa92   : > { %v3584_v63 = vadd.f32 %v3580_v7, %v3499_v11 }
 0xa93   : > { %v4614_v8 = vpop.f32.mrf.mxu0 }
 0xaa3   : > { %v3665_v13 = vpop.f32.mrf.mxu1 }
 0xaa4   : > { %v3669_v14 = vadd.f32 %v3665_v13, %v3584_v63 }
 0xaa5   : > { %v4637_v15 = vpop.f32.mrf.mxu1 }
 0xaa6   : > { %v3670_v17 = vmax.f32 %v3669_v14, 0.0 }
 0xaa8   : > { %4669 = vmatmul.mubr.msk.f32.vlgmr.msra.gmra.mxu0 %vm3687_vm8, %v3670_v17 }
 0xb68   : > { %v3757_v10 = vpop.f32.mrf.mxu0 }
 0xb69   : > { %v3758_v23 = vadd.f32 %v3757_v10, %v3686_v22 }
 0xb6a   : > { %v4670_v5 = vpop.f32.mrf.mxu0 }
 0xb6b   : > { %v3761_v25 = vmax.f32 %v3758_v23, 0.0 }
 0xb6d   : > { %4694 = vmatmul.mubr.msk.f32.vlgmr.msra.gmra.mxu1 %vm2093_vm5, %v3761_v25 }
 0xc2d   : > { %v3846_v26 = vpop.f32.mrf.mxu1 }
 0xc2e   : > { %v3847_v39 = vadd.f32 %v3846_v26, %v3773_v24 }
 0xc2f   : > { %v4695_v27 = vpop.f32.mrf.mxu1 }
 0xc30   : > { %3851 = vst.msk [vmem:[%s540_s17] sm:$0x1] %vm3850_vm9, %v3847_v39 }
 0xc31   : > { %4750 = shalt.err (!%p4747_p3)
}
 0xc32   : > { %s4751_s26 = scalar_lea.hbm %s6445_s20, 16  ;;  %s4755_s17 = scalar_lea.hbm %s6521_s19, 32 }
 0xc33   : > { %p4752_p4 = scmp.ne.s32.totalorder %s6445_s20, %s4751_s26  ;;  %p4756_p9 = scmp.lt.s32.totalorder %s6445_s20, %s6521_s19 }
 0xc34   : > { %p4757_p10 = scmp.lt.s32.totalorder %s4755_s17, %s4751_s26 }
 0xc35   : > { %p4753_p7 = pnand %p4752_p4, %p4930_p5 }
 0xc36   : > { %p4758_p11 = por %p4757_p10, %p4756_p9 }
 0xc37   : > { %p4754_p8 = pneg %p4753_p7 }
 0xc39   : > { %p4759_p12 = pnand %p4758_p11, %p4754_p8 }
 0xc3b   : > { %4762 = shalt.err (!%p4759_p12)
}
 0xc3c   : > { %4696 = dma.vmem_to_hbm [thread:$0]  (%p4930_p5), %s3866_s24, 16, %s6445_s20, %s3853_s18  }
 0xc3d PF: > { %s6522_s21 = sld [smem:[#allocation7_spill]] }
 0xc3e   : > { %s6523_s28 = sld [smem:[#allocation5_spill]] }
 0xc43   : > { %p4702_p13 = scmp.ge.s32.totalorder %s6522_s21, 2 }
 0xc44   : > { %s3877_s30 = sand.u32 1, %s6523_s28  }
 0xc45   : > { %p4699_p0 = pnand %p4702_p13, %p4934_p6  ;;  %s3878_s22 = scalar_lea.sflag [#allocation3], %s3877_s30 }
 0xc47   : > { %p4700_p1 = pneg %p4699_p0 }
 0xc49   : > { %4780 = dma.done.wait (%p4700_p1), %s3878_s22, 16  }
 0xc4a   : > { %4782 = vsyncadd (%p4700_p1), %s3878_s22, 4294967280  ;;  %s6525_s27 = sld [smem:[#allocation8_spill]]  ;;  %s6528_s24 = smov %s4789_s25 }
 0xc4b   : > { %s6526_s26 = sld [smem:[#allocation6_spill]] }
 0xc4c   : > { %s6527_s16 = sld [smem:[#allocation9_spill]] }
 0xc50   : > { %p27_p2 = scmp.ge.s32.totalorder %s6525_s27, 4  }
 0xc51   : > { %s6529_s25 = smov %s6526_s26 }
 0xc52   : > { %s6530_s26 = smov %s6527_s16  ;;  %29 = sbr.rel (!%p27_p2) target bundleno = 8 (0x8), region = 147 }
 0xc57   :  { %3882 = vsyncpa [#allocation3], 1 }
 0xc58   :  { %3884 = vsyncpa [#allocation3 + $0x1], 1 }

</bundles_post_ra>
